<compile_context>
chip_gen: v7x
topology: tpu7x:2x2x1
jax: 0.10.0
libtpu: 0.0.40
codegen_flags: <defaults>
</compile_context>

<pallas_src>
import functools

import jax
import jax.numpy as jnp
from jax.experimental import pallas as pl
from jax.experimental.pallas import tpu as pltpu

LN_EPS = 1e-5

# Activation-tile VMEM budget used to size the batch tile. Conservative so the
# double-buffered weights + activations stay well under v7x's 64 MiB VMEM.
_ACT_VMEM_BUDGET = 24 * 1024 * 1024
_VMEM_CAP = 56 * 1024 * 1024  # hard cap below v7x's 64 MiB physical VMEM


def _round_up(n, m):
    return ((n + m - 1) // m) * m


def _normalize(x):
    # LayerNorm without the affine part (gamma/beta are pre-folded into the
    # following Linear). Single-pass stats: E[x] and E[x^2] are independent
    # cross-lane reductions that can overlap on the XLUs; var = E[x^2] - mu^2
    # is clamped at 0 because f32 cancellation can make it slightly negative,
    # which would NaN the rsqrt.
    mu = jnp.mean(x, axis=-1, keepdims=True)
    ms = jnp.mean(x * x, axis=-1, keepdims=True)
    var = jnp.maximum(ms - mu * mu, 0.0)
    return (x - mu) * jax.lax.rsqrt(var + LN_EPS)


def mlp_kernel(x_ref, w1_ref, b1_ref, w2_ref, b2_ref, w3_ref, b3_ref, out_ref):
    x = x_ref[...].astype(jnp.float32)

    # fc1: Sublayer(LayerNorm -> Linear) -> ReLU      (input_dim -> hidden_dim)
    h = _normalize(x)
    h = jnp.dot(h.astype(jnp.bfloat16), w1_ref[...],
                preferred_element_type=jnp.float32) + b1_ref[...]
    h = jnp.maximum(h, 0.0)

    # hidden layer (num_layers=1, skip=False)         (hidden_dim -> hidden_dim)
    h2 = _normalize(h)
    h2 = jnp.dot(h2.astype(jnp.bfloat16), w2_ref[...],
                 preferred_element_type=jnp.float32) + b2_ref[...]
    h2 = jnp.maximum(h2, 0.0)

    # fc_out: plain Linear (max_sep=False)            (hidden_dim -> output_dim)
    out = jnp.dot(h2.astype(jnp.bfloat16), w3_ref[...],
                  preferred_element_type=jnp.float32) + b3_ref[...]
    out_ref[...] = out.astype(out_ref.dtype)

    # TODO(synk): if bundle dumps show vld/vst slot saturation at very large
    # batch tiles, strip-mine the batch inside the kernel (unrolled
    # lax.fori_loop over 64-row sub-tiles) so each LN->matmul->ReLU chain stays
    # mostly in vregs instead of round-tripping h/h2 through VMEM.


def _fold_ln_into_linear(gamma, beta, w, b):
    # LayerNorm(x) @ W + b
    #   == ((x - mu) * rsqrt(var + eps)) @ (diag(gamma) @ W) + (beta @ W + b)
    # Fold runs once, in f32, before any bf16 cast.
    w_f = w * gamma.reshape(-1, 1)
    b_f = beta @ w + b
    return w_f, b_f


def fold_and_pack_params(params):
    """Fold LN affine params into the following Linear and cast weights to bf16.

    bf16 weights are the native MXU input dtype on v5e/v6e/v7x and halve the
    weight DMA / VMEM footprint; accumulation stays f32 inside the kernel.
    """
    (g1, be1, w1, b1, g2, be2, w2, b2, w3, b3) = params
    w1f, b1f = _fold_ln_into_linear(g1, be1, w1, b1)
    w2f, b2f = _fold_ln_into_linear(g2, be2, w2, b2)
    return (w1f.astype(jnp.bfloat16), b1f,
            w2f.astype(jnp.bfloat16), b2f,
            w3.astype(jnp.bfloat16), b3)


def _choose_batch_tile(B, D_in, D_hid, D_out, x_bytes, out_bytes):
    # Per-row VMEM footprint of the batch-tiled activations:
    #   x tile (double-buffered) + h/h2 intermediates (f32) + out tile (x2).
    per_row = (2 * D_in * x_bytes
               + 2 * D_hid * 4
               + 2 * D_out * out_bytes)
    cap = max(8, (_ACT_VMEM_BUDGET // per_row) // 8 * 8)
    full = _round_up(B, 8)
    if full <= cap:
        # One grid step: on single-TC chips (v5e/v6e) extra steps buy almost no
        # pipelining but pay ~0.35us per-step overhead each, which dominates
        # this small, DMA/overhead-bound kernel.
        return full
    # Multi-step grid: keep the tile MXU-friendly (multiple of 256 fills the
    # v6e/v7x 256x256 MXU and is 128-aligned for v5e).
    return cap if cap < 256 else (cap // 256) * 256


@functools.partial(jax.jit, static_argnames=("block_b", "out_dtype"))
def mlp_forward(x, packed_params, block_b=None, out_dtype=jnp.bfloat16):
    """x: [B, input_dim] (f32 or bf16). packed_params: from fold_and_pack_params."""
    w1, b1, w2, b2, w3, b3 = packed_params
    B, D_in = x.shape
    D_hid = w1.shape[1]
    D_out = w3.shape[1]
    x_bytes = jnp.dtype(x.dtype).itemsize
    out_bytes = jnp.dtype(out_dtype).itemsize

    if block_b is None:
        bb = _choose_batch_tile(B, D_in, D_hid, D_out, x_bytes, out_bytes)
    else:
        bb = min(_round_up(block_b, 8), _round_up(B, 8))
    grid = (pl.cdiv(B, bb),)

    # Constant-index param blocks: Pallas does not re-issue the DMA when the
    # index_map result is unchanged across grid steps, so these stay resident
    # in VMEM for the whole call.
    rep = lambda shape: pl.BlockSpec(shape, lambda i: (0, 0))

    # VMEM budget from the actual working set (weights conservatively counted
    # double-buffered), with headroom, capped below v7x's 64 MiB physical VMEM.
    weight_bytes = (w1.size + w2.size + w3.size) * 2          # bf16
    bias_bytes = (b1.size + b2.size + b3.size) * 4            # f32
    act_bytes = bb * (2 * D_in * x_bytes
                      + 2 * D_hid * 4
                      + 2 * D_out * out_bytes)
    vmem_limit = int(min(_VMEM_CAP,
                         max(16 * 1024 * 1024,
                             2 * (weight_bytes + bias_bytes) + 2 * act_bytes
                             + 4 * 1024 * 1024)))

    flops = 2 * B * (D_in * D_hid + D_hid * D_hid + D_hid * D_out)
    bytes_accessed = (B * D_in * x_bytes + B * D_out * out_bytes
                      + weight_bytes + bias_bytes)

    # TODO(synk): for production widths (hidden_dim >= 4096) the fully-resident
    # weight scheme no longer fits v7x's 64 MiB VMEM: add an "arbitrary"
    # trailing grid axis over the hidden/output dims with a pl.when-guarded f32
    # accumulator (or a nested pltpu.emit_pipeline) and single-buffer the
    # resident weight blocks (pipeline_mode=pl.Buffered(1)).
    # TODO(synk): on v7x, verify with xprof that the batch grid shards across
    # both TensorCores; if one TC idles, switch to pltpu.CORE_PARALLEL / an
    # explicit core axis and keep the grid length a multiple of 2.
    return pl.pallas_call(
        mlp_kernel,
        out_shape=jax.ShapeDtypeStruct((B, D_out), out_dtype),
        grid_spec=pltpu.PrefetchScalarGridSpec(
            num_scalar_prefetch=0,
            grid=grid,
            in_specs=[
                pl.BlockSpec((bb, D_in), lambda i: (i, 0)),  # x (batch tile)
                rep((D_in, D_hid)),    # W1 (bf16, LN1 gamma folded in)
                rep((1, D_hid)),       # b1 (f32, LN1 beta folded in)
                rep((D_hid, D_hid)),   # W2 (bf16, LN2 gamma folded in)
                rep((1, D_hid)),       # b2 (f32, LN2 beta folded in)
                rep((D_hid, D_out)),   # W3 (bf16, unpadded)
                rep((1, D_out)),       # b3 (f32, unpadded)
            ],
            out_specs=pl.BlockSpec((bb, D_out), lambda i: (i, 0)),
        ),
        compiler_params=pltpu.CompilerParams(
            dimension_semantics=("parallel",),   # batch axis
            vmem_limit_bytes=vmem_limit),
        cost_estimate=pl.CostEstimate(
            flops=flops, transcendentals=2 * B, bytes_accessed=bytes_accessed),
    )(x, w1, b1, w2, b2, w3, b3)


def init_params(key, input_dim, hidden_dim, output_dim):
    k1, k2, k3, kb1, kb2, kb3, kg1, kbe1, kg2, kbe2 = jax.random.split(key, 10)

    def linear_init(kw, kb, fan_in, fan_out):
        # Deterministic stand-in for nn.Linear init (uniform +- 1/sqrt(fan_in)).
        bound = 1.0 / jnp.sqrt(fan_in)
        w = jax.random.uniform(kw, (fan_in, fan_out), jnp.float32, -bound, bound)
        b = jax.random.uniform(kb, (1, fan_out), jnp.float32, -bound, bound)
        return w, b

    w1, b1 = linear_init(k1, kb1, input_dim, hidden_dim)
    w2, b2 = linear_init(k2, kb2, hidden_dim, hidden_dim)
    w3, b3 = linear_init(k3, kb3, hidden_dim, output_dim)

    # PyTorch LayerNorm default init is ones/zeros (for which the fold is
    # exact); perturb slightly here so the test actually exercises the
    # gamma/beta -> weight/bias folding path.
    g1 = 1.0 + 0.1 * jax.random.normal(kg1, (1, input_dim), jnp.float32)
    be1 = 0.1 * jax.random.normal(kbe1, (1, input_dim), jnp.float32)
    g2 = 1.0 + 0.1 * jax.random.normal(kg2, (1, hidden_dim), jnp.float32)
    be2 = 0.1 * jax.random.normal(kbe2, (1, hidden_dim), jnp.float32)

    return (g1, be1, w1, b1, g2, be2, w2, b2, w3, b3)


def mlp_reference_mirror(x, params):
    # Mirrors the kernel's numerics (independent re-derivation of the LN fold,
    # bf16 MXU operands, f32 accumulation) so the tight check isolates kernel
    # bugs from bf16 rounding.
    (g1, be1, w1, b1, g2, be2, w2, b2, w3, b3) = params
    w1f, b1f = _fold_ln_into_linear(g1, be1, w1, b1)
    w2f, b2f = _fold_ln_into_linear(g2, be2, w2, b2)

    def mm(a, w):
        return jnp.dot(a.astype(jnp.bfloat16), w.astype(jnp.bfloat16),
                       preferred_element_type=jnp.float32)

    h = jnp.maximum(mm(_normalize(x.astype(jnp.float32)), w1f) + b1f, 0.0)
    h2 = jnp.maximum(mm(_normalize(h), w2f) + b2f, 0.0)
    return mm(h2, w3) + b3


def mlp_reference_f32(x, params):
    # Pure f32 "module semantics" reference (LayerNorm affine applied on
    # activations, f32 matmuls) -- loose tolerance check for semantic drift.
    (g1, be1, w1, b1, g2, be2, w2, b2, w3, b3) = params

    def ln(v, g, b):
        mu = jnp.mean(v, axis=-1, keepdims=True)
        var = jnp.mean((v - mu) ** 2, axis=-1, keepdims=True)
        return (v - mu) * jax.lax.rsqrt(var + LN_EPS) * g + b

    h = jnp.maximum(ln(x, g1, be1) @ w1 + b1, 0.0)
    h2 = jnp.maximum(ln(h, g2, be2) @ w2 + b2, 0.0)
    return h2 @ w3 + b3


if __name__ == "__main__":
    key = jax.random.PRNGKey(0)
    kx, kp = jax.random.split(key)

    # Small demo shapes consistent with the module defaults (hidden_dim=128).
    B, input_dim, hidden_dim, output_dim = 256, 32, 128, 16
    x = jax.random.normal(kx, (B, input_dim), jnp.float32)
    params = init_params(kp, input_dim, hidden_dim, output_dim)
    packed = fold_and_pack_params(params)

    out = mlp_forward(x, packed)
    out = jax.block_until_ready(out)
    assert out.shape == (B, output_dim)
    out_f32 = out.astype(jnp.float32)

    ref_mirror = mlp_reference_mirror(x, params)
    assert jnp.allclose(out_f32, ref_mirror, atol=2e-2, rtol=2e-2), \
        "mismatch vs bf16-mirror reference"

    ref_f32 = mlp_reference_f32(x, params)
    assert jnp.allclose(out_f32, ref_f32, atol=2e-1, rtol=2e-1), \
        "mismatch vs f32 module-semantics reference"

    # TODO(synk): dropout (train-mode), the skip-connection branch (skip=True)
    # and the max_sep output head are not exercised by the default module args
    # and are omitted from the kernel.
    print("KERNEL_OK")
</pallas_src>

<mosaic_0001>
module attributes {stable_mosaic.version = 11 : i64} {
  func.func @mlp_kernel(%arg0: i32, %arg1: memref<256x32xf32, #tpu.memory_space<vmem>>, %arg2: memref<32x128xbf16, #tpu.memory_space<vmem>>, %arg3: memref<1x128xf32, #tpu.memory_space<vmem>>, %arg4: memref<128x128xbf16, #tpu.memory_space<vmem>>, %arg5: memref<1x128xf32, #tpu.memory_space<vmem>>, %arg6: memref<128x16xbf16, #tpu.memory_space<vmem>>, %arg7: memref<1x16xf32, #tpu.memory_space<vmem>>, %arg8: memref<256x16xbf16, #tpu.memory_space<vmem>>) attributes {dimension_semantics = [#tpu.dimension_semantics<parallel>], iteration_bounds = array<i64: 1>, scalar_prefetch = 0 : i64, scratch_operands = 0 : i64, tpu.core_type = #tpu.core_type<tc>, window_params = [{transform_indices = @transform_0, window_bounds = array<i64: 256, 32>}, {pipeline_mode = #tpu.pipeline_mode<synchronous>, transform_indices = @transform_1, window_bounds = array<i64: 32, 128>}, {pipeline_mode = #tpu.pipeline_mode<synchronous>, transform_indices = @transform_2, window_bounds = array<i64: 1, 128>}, {pipeline_mode = #tpu.pipeline_mode<synchronous>, transform_indices = @transform_3, window_bounds = array<i64: 128, 128>}, {pipeline_mode = #tpu.pipeline_mode<synchronous>, transform_indices = @transform_4, window_bounds = array<i64: 1, 128>}, {pipeline_mode = #tpu.pipeline_mode<synchronous>, transform_indices = @transform_5, window_bounds = array<i64: 128, 16>}, {pipeline_mode = #tpu.pipeline_mode<synchronous>, transform_indices = @transform_6, window_bounds = array<i64: 1, 16>}, {transform_indices = @transform_7, window_bounds = array<i64: 256, 16>}]} {
    %c0 = arith.constant 0 : index
    %c0_0 = arith.constant 0 : index
    %0 = vector.load %arg1[%c0, %c0_0] : memref<256x32xf32, #tpu.memory_space<vmem>>, vector<256x32xf32>
    %cst = arith.constant dense<0.000000e+00> : vector<256xf32>
    %1 = vector.multi_reduction <add>, %0, %cst [1] : vector<256x32xf32> to vector<256xf32>
    %2 = vector.shape_cast %1 : vector<256xf32> to vector<256x1xf32>
    %cst_1 = arith.constant 3.200000e+01 : f32
    %3 = vector.broadcast %cst_1 : f32 to vector<256x1xf32>
    %4 = arith.divf %2, %3 : vector<256x1xf32>
    %5 = arith.mulf %0, %0 : vector<256x32xf32>
    %cst_2 = arith.constant dense<0.000000e+00> : vector<256xf32>
    %6 = vector.multi_reduction <add>, %5, %cst_2 [1] : vector<256x32xf32> to vector<256xf32>
    %7 = vector.shape_cast %6 : vector<256xf32> to vector<256x1xf32>
    %cst_3 = arith.constant 3.200000e+01 : f32
    %8 = vector.broadcast %cst_3 : f32 to vector<256x1xf32>
    %9 = arith.divf %7, %8 : vector<256x1xf32>
    %10 = arith.mulf %4, %4 : vector<256x1xf32>
    %11 = arith.subf %9, %10 : vector<256x1xf32>
    %cst_4 = arith.constant 0.000000e+00 : f32
    %12 = vector.broadcast %cst_4 : f32 to vector<256x1xf32>
    %13 = arith.maximumf %11, %12 : vector<256x1xf32>
    %14 = vector.broadcast %4 : vector<256x1xf32> to vector<256x32xf32>
    %15 = arith.subf %0, %14 : vector<256x32xf32>
    %cst_5 = arith.constant 9.99999974E-6 : f32
    %16 = vector.broadcast %cst_5 : f32 to vector<256x1xf32>
    %17 = arith.addf %13, %16 : vector<256x1xf32>
    %18 = math.rsqrt %17 : vector<256x1xf32>
    %19 = vector.broadcast %18 : vector<256x1xf32> to vector<256x32xf32>
    %20 = arith.mulf %15, %19 : vector<256x32xf32>
    %21 = arith.truncf %20 : vector<256x32xf32> to vector<256x32xbf16>
    %c0_6 = arith.constant 0 : index
    %c0_7 = arith.constant 0 : index
    %22 = vector.load %arg2[%c0_6, %c0_7] : memref<32x128xbf16, #tpu.memory_space<vmem>>, vector<32x128xbf16>
    %cst_8 = arith.constant dense<0.000000e+00> : vector<256x128xf32>
    %23 = tpu.matmul %21, %22, %cst_8 {dimension_numbers = #tpu.dot_dimension_numbers<[1], [0], [0], [1], [0, 0, 1, 1], [], []>} : vector<256x32xbf16>, vector<32x128xbf16>, vector<256x128xf32> -> vector<256x128xf32>
    %c0_9 = arith.constant 0 : index
    %c0_10 = arith.constant 0 : index
    %24 = vector.load %arg3[%c0_9, %c0_10] : memref<1x128xf32, #tpu.memory_space<vmem>>, vector<1x128xf32>
    %25 = vector.broadcast %24 : vector<1x128xf32> to vector<256x128xf32>
    %26 = arith.addf %23, %25 : vector<256x128xf32>
    %cst_11 = arith.constant 0.000000e+00 : f32
    %27 = vector.broadcast %cst_11 : f32 to vector<256x128xf32>
    %28 = arith.maximumf %26, %27 : vector<256x128xf32>
    %cst_12 = arith.constant dense<0.000000e+00> : vector<256xf32>
    %29 = vector.multi_reduction <add>, %28, %cst_12 [1] : vector<256x128xf32> to vector<256xf32>
    %30 = vector.shape_cast %29 : vector<256xf32> to vector<256x1xf32>
    %cst_13 = arith.constant 1.280000e+02 : f32
    %31 = vector.broadcast %cst_13 : f32 to vector<256x1xf32>
    %32 = arith.divf %30, %31 : vector<256x1xf32>
    %33 = arith.mulf %28, %28 : vector<256x128xf32>
    %cst_14 = arith.constant dense<0.000000e+00> : vector<256xf32>
    %34 = vector.multi_reduction <add>, %33, %cst_14 [1] : vector<256x128xf32> to vector<256xf32>
    %35 = vector.shape_cast %34 : vector<256xf32> to vector<256x1xf32>
    %cst_15 = arith.constant 1.280000e+02 : f32
    %36 = vector.broadcast %cst_15 : f32 to vector<256x1xf32>
    %37 = arith.divf %35, %36 : vector<256x1xf32>
    %38 = arith.mulf %32, %32 : vector<256x1xf32>
    %39 = arith.subf %37, %38 : vector<256x1xf32>
    %cst_16 = arith.constant 0.000000e+00 : f32
    %40 = vector.broadcast %cst_16 : f32 to vector<256x1xf32>
    %41 = arith.maximumf %39, %40 : vector<256x1xf32>
    %42 = vector.broadcast %32 : vector<256x1xf32> to vector<256x128xf32>
    %43 = arith.subf %28, %42 : vector<256x128xf32>
    %cst_17 = arith.constant 9.99999974E-6 : f32
    %44 = vector.broadcast %cst_17 : f32 to vector<256x1xf32>
    %45 = arith.addf %41, %44 : vector<256x1xf32>
    %46 = math.rsqrt %45 : vector<256x1xf32>
    %47 = vector.broadcast %46 : vector<256x1xf32> to vector<256x128xf32>
    %48 = arith.mulf %43, %47 : vector<256x128xf32>
    %49 = arith.truncf %48 : vector<256x128xf32> to vector<256x128xbf16>
    %c0_18 = arith.constant 0 : index
    %c0_19 = arith.constant 0 : index
    %50 = vector.load %arg4[%c0_18, %c0_19] : memref<128x128xbf16, #tpu.memory_space<vmem>>, vector<128x128xbf16>
    %cst_20 = arith.constant dense<0.000000e+00> : vector<256x128xf32>
    %51 = tpu.matmul %49, %50, %cst_20 {dimension_numbers = #tpu.dot_dimension_numbers<[1], [0], [0], [1], [0, 0, 1, 1], [], []>} : vector<256x128xbf16>, vector<128x128xbf16>, vector<256x128xf32> -> vector<256x128xf32>
    %c0_21 = arith.constant 0 : index
    %c0_22 = arith.constant 0 : index
    %52 = vector.load %arg5[%c0_21, %c0_22] : memref<1x128xf32, #tpu.memory_space<vmem>>, vector<1x128xf32>
    %53 = vector.broadcast %52 : vector<1x128xf32> to vector<256x128xf32>
    %54 = arith.addf %51, %53 : vector<256x128xf32>
    %cst_23 = arith.constant 0.000000e+00 : f32
    %55 = vector.broadcast %cst_23 : f32 to vector<256x128xf32>
    %56 = arith.maximumf %54, %55 : vector<256x128xf32>
    %57 = arith.truncf %56 : vector<256x128xf32> to vector<256x128xbf16>
    %c0_24 = arith.constant 0 : index
    %c0_25 = arith.constant 0 : index
    %58 = vector.load %arg6[%c0_24, %c0_25] : memref<128x16xbf16, #tpu.memory_space<vmem>>, vector<128x16xbf16>
    %cst_26 = arith.constant dense<0.000000e+00> : vector<256x16xf32>
    %59 = tpu.matmul %57, %58, %cst_26 {dimension_numbers = #tpu.dot_dimension_numbers<[1], [0], [0], [1], [0, 0, 1, 1], [], []>} : vector<256x128xbf16>, vector<128x16xbf16>, vector<256x16xf32> -> vector<256x16xf32>
    %c0_27 = arith.constant 0 : index
    %c0_28 = arith.constant 0 : index
    %60 = vector.load %arg7[%c0_27, %c0_28] : memref<1x16xf32, #tpu.memory_space<vmem>>, vector<1x16xf32>
    %61 = vector.broadcast %60 : vector<1x16xf32> to vector<256x16xf32>
    %62 = arith.addf %59, %61 : vector<256x16xf32>
    %63 = arith.truncf %62 : vector<256x16xf32> to vector<256x16xbf16>
    %c0_29 = arith.constant 0 : index
    %c0_30 = arith.constant 0 : index
    %64 = vector.load %arg8[%c0_29, %c0_30] : memref<256x16xbf16, #tpu.memory_space<vmem>>, vector<256x16xbf16>
    tpu.vector_store %arg8[%c0_29, %c0_30], %63 {strides = array<i32>} : memref<256x16xbf16, #tpu.memory_space<vmem>>, vector<256x16xbf16>,
    return
  }
  func.func @transform_0(%arg0: i32) -> (i32, i32) {
    %c0_i32 = arith.constant 0 : i32
    %c0_i32_0 = arith.constant 0 : i32
    return %arg0, %c0_i32 : i32, i32
  }
  func.func @transform_1(%arg0: i32) -> (i32, i32) {
    %c0_i32 = arith.constant 0 : i32
    %c0_i32_0 = arith.constant 0 : i32
    %c0_i32_1 = arith.constant 0 : i32
    return %c0_i32, %c0_i32_0 : i32, i32
  }
  func.func @transform_2(%arg0: i32) -> (i32, i32) {
    %c0_i32 = arith.constant 0 : i32
    %c0_i32_0 = arith.constant 0 : i32
    %c0_i32_1 = arith.constant 0 : i32
    return %c0_i32, %c0_i32_0 : i32, i32
  }
  func.func @transform_3(%arg0: i32) -> (i32, i32) {
    %c0_i32 = arith.constant 0 : i32
    %c0_i32_0 = arith.constant 0 : i32
    %c0_i32_1 = arith.constant 0 : i32
    return %c0_i32, %c0_i32_0 : i32, i32
  }
  func.func @transform_4(%arg0: i32) -> (i32, i32) {
    %c0_i32 = arith.constant 0 : i32
    %c0_i32_0 = arith.constant 0 : i32
    %c0_i32_1 = arith.constant 0 : i32
    return %c0_i32, %c0_i32_0 : i32, i32
  }
  func.func @transform_5(%arg0: i32) -> (i32, i32) {
    %c0_i32 = arith.constant 0 : i32
    %c0_i32_0 = arith.constant 0 : i32
    %c0_i32_1 = arith.constant 0 : i32
    return %c0_i32, %c0_i32_0 : i32, i32
  }
  func.func @transform_6(%arg0: i32) -> (i32, i32) {
    %c0_i32 = arith.constant 0 : i32
    %c0_i32_0 = arith.constant 0 : i32
    %c0_i32_1 = arith.constant 0 : i32
    return %c0_i32, %c0_i32_0 : i32, i32
  }
  func.func @transform_7(%arg0: i32) -> (i32, i32) {
    %c0_i32 = arith.constant 0 : i32
    %c0_i32_0 = arith.constant 0 : i32
    return %arg0, %c0_i32 : i32, i32
  }
}

</mosaic_0001>

<bundles_post_ra>
// kernel: mlp_forward.1
= control target key start
LH: loop header
LB: loop body
LE: loop exit
PB: predicated region body
PF: predicated region fallthrough
CT: control target
= control target key end

     0   :  { %vm59_vm0 = vcmask 261120   ;;  %vm1958_vm1 = vcmask 125952   ;;  %s3722_s0 = inlined_call_operand.vmem [shape: f32[256,32], index: 0, kind: input, shape index: {}]   ;;  %s3723_s1 = inlined_call_operand.vmem [shape: bf16[32,128], index: 1, kind: input, shape index: {}]   ;;  %s3724_s2 = inlined_call_operand.vmem [shape: f32[1,128], index: 2, kind: input, shape index: {}]   ;;  %s3725_s3 = inlined_call_operand.vmem [shape: bf16[128,128], index: 3, kind: input, shape index: {}]   ;;  %s3726_s5 = inlined_call_operand.vmem [shape: bf16[128,16], index: 5, kind: input, shape index: {}]   ;;  %s3727_s4 = inlined_call_operand.vmem [shape: f32[1,128], index: 4, kind: input, shape index: {}]   ;;  %s3728_s6 = inlined_call_operand.vmem [shape: f32[1,16], index: 6, kind: input, shape index: {}]   ;;  %s3729_s7 = inlined_call_operand.vmem [shape: bf16[256,16], index: 7, kind: output, shape index: {}]  }
   0x1   :  { %v2487_v0 = vld [vmem:[%s3722_s0 + $0x10] sm:$0xff]  ;;  %v2492_v1 = vld [vmem:[%s3722_s0] sm:$0xff]  ;;  %v2497_v2 = vld [vmem:[%s3722_s0 + $0x18] sm:$0xff] }
   0x2   :  { %v66_v3 = vsel %vm59_vm0, %v2487_v0, 0.0  ;;  %v60_v4 = vsel %vm59_vm0, %v2492_v1, 0.0  ;;  %v2506_v5 = vld [vmem:[%s3722_s0 + $0x8] sm:$0xff]  ;;  %v69_v6 = vsel %vm59_vm0, %v2497_v2, 0.0  ;;  %v189_v9 = vmul.f32 %v2492_v1, %v2492_v1  ;;  %v2532_v17 = vld [vmem:[%s3722_s0 + $0x20] sm:$0xff]  ;;  %v2541_v20 = vld [vmem:[%s3722_s0 + $0x38] sm:$0xff] }
   0x3   :  { %67 = vadd.xlane.f32.xlu1 %v66_v3  ;;  %61 = vadd.xlane.f32.xlu0 %v60_v4  ;;  %v63_v7 = vsel %vm59_vm0, %v2506_v5, 0.0  ;;  %v190_v8 = vmul.f32 %v2506_v5, %v2506_v5  ;;  %v192_v12 = vmul.f32 %v2497_v2, %v2497_v2  ;;  %v191_v13 = vmul.f32 %v2487_v0, %v2487_v0  ;;  %v2527_v16 = vld [vmem:[%s3722_s0 + $0x28] sm:$0xff]  ;;  %v2546_v21 = vld [vmem:[%s3722_s0 + $0x30] sm:$0xff]  ;;  %v2572_v33 = vld [vmem:[%s3722_s0 + $0x40] sm:$0xff] }
   0x4   :  { %v221_v11 = vsel %vm59_vm0, %v189_v9, 0.0  ;;  %v75_v18 = vsel %vm59_vm0, %v2527_v16, 0.0  ;;  %v72_v19 = vsel %vm59_vm0, %v2532_v17, 0.0  ;;  %v81_v22 = vsel %vm59_vm0, %v2541_v20, 0.0  ;;  %v2567_v32 = vld [vmem:[%s3722_s0 + $0x48] sm:$0xff]  ;;  %v2581_v36 = vld [vmem:[%s3722_s0 + $0x58] sm:$0xff] }
   0x5   :  { %v224_v10 = vsel %vm59_vm0, %v190_v8, 0.0  ;;  %v230_v14 = vsel %vm59_vm0, %v192_v12, 0.0  ;;  %v227_v15 = vsel %vm59_vm0, %v191_v13, 0.0  ;;  %v78_v23 = vsel %vm59_vm0, %v2546_v21, 0.0  ;;  %v2586_v37 = vld [vmem:[%s3722_s0 + $0x50] sm:$0xff]  ;;  %v2298_v46 = vld [vmem:[%s3723_s1] sm:$0xff]  }
   0x6   :  { %v194_v24 = vmul.f32 %v2527_v16, %v2527_v16  ;;  %v193_v25 = vmul.f32 %v2532_v17, %v2532_v17  ;;  %v196_v28 = vmul.f32 %v2541_v20, %v2541_v20  ;;  %v195_v29 = vmul.f32 %v2546_v21, %v2546_v21  ;;  %v2610_v49 = vld [vmem:[%s3722_s0 + $0x68] sm:$0xff]  ;;  %v2615_v50 = vld [vmem:[%s3722_s0 + $0x60] sm:$0xff]  ;;  %2162 = vmatprep.subr.bf16.mxu0 %v2298_v46  ;;  %v2627_v54 = vld [vmem:[%s3722_s0 + $0x78] sm:$0xff] }
   0x7   :  { %70 = vadd.xlane.f32.xlu1 %v69_v6  ;;  %64 = vadd.xlane.f32.xlu0 %v63_v7  ;;  %v87_v34 = vsel %vm59_vm0, %v2567_v32, 0.0  ;;  %v84_v35 = vsel %vm59_vm0, %v2572_v33, 0.0  ;;  %v93_v38 = vsel %vm59_vm0, %v2581_v36, 0.0  ;;  %v90_v39 = vsel %vm59_vm0, %v2586_v37, 0.0  ;;  %v2299_v51 = vld [vmem:[%s3723_s1 + $0x8] sm:$0xff]   ;;  %v2632_v55 = vld [vmem:[%s3722_s0 + $0x70] sm:$0xff] }
   0x8   :  { %v236_v26 = vsel %vm59_vm0, %v194_v24, 0.0  ;;  %v233_v27 = vsel %vm59_vm0, %v193_v25, 0.0  ;;  %v242_v30 = vsel %vm59_vm0, %v196_v28, 0.0  ;;  %v239_v31 = vsel %vm59_vm0, %v195_v29, 0.0  ;;  %2294 = vmatprep.subr.bf16.mxu1 %v2298_v46  ;;  %2163 = vmatpush3.bf16.msra.mxu0 %v2298_v46  ;;  %v2653_v6 = vld [vmem:[%s3722_s0 + $0x88] sm:$0xff]  ;;  %v2658_v7 = vld [vmem:[%s3722_s0 + $0x80] sm:$0xff] }
   0x9   :  { %v198_v40 = vmul.f32 %v2567_v32, %v2567_v32  ;;  %v197_v41 = vmul.f32 %v2572_v33, %v2572_v33  ;;  %v200_v44 = vmul.f32 %v2581_v36, %v2581_v36  ;;  %v199_v45 = vmul.f32 %v2586_v37, %v2586_v37  ;;  %2296 = vmatpush3.bf16.msra.mxu1 %v2298_v46  ;;  %v2733_v46 = vld [vmem:[%s3722_s0 + $0xc8] sm:$0xff] }
   0xa   :  { %v99_v52 = vsel %vm59_vm0, %v2610_v49, 0.0  ;;  %v96_v53 = vsel %vm59_vm0, %v2615_v50, 0.0  ;;  %2164 = vmatprep.subr.bf16.mxu0 %v2299_v51  ;;  %2295 = vmatprep.subr.bf16.mxu1 %v2299_v51  ;;  %v105_v56 = vsel %vm59_vm0, %v2627_v54, 0.0  ;;  %v102_v57 = vsel %vm59_vm0, %v2632_v55, 0.0 }
   0xb   :  { %225 = vadd.xlane.f32.xlu1 %v224_v10  ;;  %222 = vadd.xlane.f32.xlu0 %v221_v11  ;;  %v248_v42 = vsel %vm59_vm0, %v198_v40, 0.0  ;;  %v245_v43 = vsel %vm59_vm0, %v197_v41, 0.0  ;;  %v254_v47 = vsel %vm59_vm0, %v200_v44, 0.0  ;;  %v251_v48 = vsel %vm59_vm0, %v199_v45, 0.0  ;;  %v2667_v10 = vld [vmem:[%s3722_s0 + $0x98] sm:$0xff]  ;;  %v2672_v11 = vld [vmem:[%s3722_s0 + $0x90] sm:$0xff] }
   0xc   :  { %2165 = vmatpush3.bf16.msra.mxu0 %v2299_v51  ;;  %v202_v58 = vmul.f32 %v2610_v49, %v2610_v49  ;;  %v201_v59 = vmul.f32 %v2615_v50, %v2615_v50  ;;  %v204_v62 = vmul.f32 %v2627_v54, %v2627_v54  ;;  %v203_v63 = vmul.f32 %v2632_v55, %v2632_v55 }
   0xd   :  { %2297 = vmatpush3.bf16.msra.mxu1 %v2299_v51  ;;  %v111_v8 = vsel %vm59_vm0, %v2653_v6, 0.0  ;;  %v108_v9 = vsel %vm59_vm0, %v2658_v7, 0.0  ;;  %v117_v12 = vsel %vm59_vm0, %v2667_v10, 0.0  ;;  %v114_v13 = vsel %vm59_vm0, %v2672_v11, 0.0 }
   0xe   :  { %v260_v60 = vsel %vm59_vm0, %v202_v58, 0.0  ;;  %v257_v61 = vsel %vm59_vm0, %v201_v59, 0.0  ;;  %v266_v3 = vsel %vm59_vm0, %v204_v62, 0.0  ;;  %v263_v4 = vsel %vm59_vm0, %v203_v63, 0.0 }
   0xf   :  { %231 = vadd.xlane.f32.xlu1 %v230_v14  ;;  %228 = vadd.xlane.f32.xlu0 %v227_v15  ;;  %v206_v14 = vmul.f32 %v2653_v6, %v2653_v6  ;;  %v205_v15 = vmul.f32 %v2658_v7, %v2658_v7  ;;  %v214_v58 = vmul.f32 %v2733_v46, %v2733_v46 }
  0x13   :  { %76 = vadd.xlane.f32.xlu1 %v75_v18  ;;  %73 = vadd.xlane.f32.xlu0 %v72_v19  ;;  %v272_v18 = vsel %vm59_vm0, %v206_v14, 0.0  ;;  %v269_v19 = vsel %vm59_vm0, %v205_v15, 0.0  ;;  %v2787_v14 = vld [vmem:[%s3722_s0 + $0xf8] sm:$0xff]  ;;  %v2792_v15 = vld [vmem:[%s3722_s0 + $0xf0] sm:$0xff] }
  0x17   :  { %82 = vadd.xlane.f32.xlu1 %v81_v22  ;;  %79 = vadd.xlane.f32.xlu0 %v78_v23  ;;  %v208_v22 = vmul.f32 %v2667_v10, %v2667_v10  ;;  %v207_v23 = vmul.f32 %v2672_v11, %v2672_v11 }
  0x19   :  { %v278_v24 = vsel %vm59_vm0, %v208_v22, 0.0  ;;  %v275_v25 = vsel %vm59_vm0, %v207_v23, 0.0 }
  0x1b   :  { %237 = vadd.xlane.f32.xlu1 %v236_v26  ;;  %234 = vadd.xlane.f32.xlu0 %v233_v27  ;;  %v2693_v26 = vld [vmem:[%s3722_s0 + $0xa8] sm:$0xff]  ;;  %v2698_v27 = vld [vmem:[%s3722_s0 + $0xa0] sm:$0xff] }
  0x1c   :  { %v123_v28 = vsel %vm59_vm0, %v2693_v26, 0.0  ;;  %v120_v29 = vsel %vm59_vm0, %v2698_v27, 0.0 }
  0x1f   :  { %243 = vadd.xlane.f32.xlu1 %v242_v30  ;;  %240 = vadd.xlane.f32.xlu0 %v239_v31  ;;  %v2707_v30 = vld [vmem:[%s3722_s0 + $0xb8] sm:$0xff]  ;;  %v2712_v31 = vld [vmem:[%s3722_s0 + $0xb0] sm:$0xff] }
  0x23   :  { %88 = vadd.xlane.f32.xlu1 %v87_v34  ;;  %85 = vadd.xlane.f32.xlu0 %v84_v35  ;;  %v129_v34 = vsel %vm59_vm0, %v2707_v30, 0.0  ;;  %v126_v35 = vsel %vm59_vm0, %v2712_v31, 0.0 }
  0x27   :  { %94 = vadd.xlane.f32.xlu1 %v93_v38  ;;  %91 = vadd.xlane.f32.xlu0 %v90_v39  ;;  %v210_v38 = vmul.f32 %v2693_v26, %v2693_v26  ;;  %v209_v39 = vmul.f32 %v2698_v27, %v2698_v27 }
  0x29   :  { %v284_v40 = vsel %vm59_vm0, %v210_v38, 0.0  ;;  %v281_v41 = vsel %vm59_vm0, %v209_v39, 0.0 }
  0x2b   :  { %249 = vadd.xlane.f32.xlu1 %v248_v42  ;;  %246 = vadd.xlane.f32.xlu0 %v245_v43  ;;  %v212_v42 = vmul.f32 %v2707_v30, %v2707_v30  ;;  %v211_v43 = vmul.f32 %v2712_v31, %v2712_v31 }
  0x2d   :  { %v290_v44 = vsel %vm59_vm0, %v212_v42, 0.0  ;;  %v287_v45 = vsel %vm59_vm0, %v211_v43, 0.0 }
  0x2f   :  { %255 = vadd.xlane.f32.xlu1 %v254_v47  ;;  %252 = vadd.xlane.f32.xlu0 %v251_v48  ;;  %v2738_v47 = vld [vmem:[%s3722_s0 + $0xc0] sm:$0xff]  ;;  %v135_v48 = vsel %vm59_vm0, %v2733_v46, 0.0 }
  0x30   :  { %v132_v51 = vsel %vm59_vm0, %v2738_v47, 0.0  ;;  %v213_v59 = vmul.f32 %v2738_v47, %v2738_v47 }
  0x33   :  { %100 = vadd.xlane.f32.xlu1 %v99_v52  ;;  %97 = vadd.xlane.f32.xlu0 %v96_v53  ;;  %v2747_v52 = vld [vmem:[%s3722_s0 + $0xd8] sm:$0xff]  ;;  %v2752_v53 = vld [vmem:[%s3722_s0 + $0xd0] sm:$0xff] }
  0x34   :  { %v216_v62 = vmul.f32 %v2747_v52, %v2747_v52  ;;  %v215_v63 = vmul.f32 %v2752_v53, %v2752_v53 }
  0x37   :  { %106 = vadd.xlane.f32.xlu1 %v105_v56  ;;  %103 = vadd.xlane.f32.xlu0 %v102_v57  ;;  %v141_v56 = vsel %vm59_vm0, %v2747_v52, 0.0  ;;  %v138_v57 = vsel %vm59_vm0, %v2752_v53, 0.0 }
  0x3b   :  { %261 = vadd.xlane.f32.xlu1 %v260_v60  ;;  %258 = vadd.xlane.f32.xlu0 %v257_v61  ;;  %v296_v60 = vsel %vm59_vm0, %v214_v58, 0.0  ;;  %v293_v61 = vsel %vm59_vm0, %v213_v59, 0.0 }
  0x3f   :  { %267 = vadd.xlane.f32.xlu1 %v266_v3  ;;  %264 = vadd.xlane.f32.xlu0 %v263_v4  ;;  %v302_v3 = vsel %vm59_vm0, %v216_v62, 0.0  ;;  %v299_v4 = vsel %vm59_vm0, %v215_v63, 0.0 }
  0x43   :  { %112 = vadd.xlane.f32.xlu1 %v111_v8  ;;  %109 = vadd.xlane.f32.xlu0 %v108_v9  ;;  %v2773_v8 = vld [vmem:[%s3722_s0 + $0xe8] sm:$0xff]  ;;  %v2778_v9 = vld [vmem:[%s3722_s0 + $0xe0] sm:$0xff] }
  0x44   :  { %v218_v22 = vmul.f32 %v2773_v8, %v2773_v8  ;;  %v217_v23 = vmul.f32 %v2778_v9, %v2778_v9 }
  0x47   :  { %118 = vadd.xlane.f32.xlu1 %v117_v12  ;;  %115 = vadd.xlane.f32.xlu0 %v114_v13  ;;  %v147_v12 = vsel %vm59_vm0, %v2773_v8, 0.0  ;;  %v144_v13 = vsel %vm59_vm0, %v2778_v9, 0.0 }
  0x4b   :  { %273 = vadd.xlane.f32.xlu1 %v272_v18  ;;  %270 = vadd.xlane.f32.xlu0 %v269_v19  ;;  %v153_v18 = vsel %vm59_vm0, %v2787_v14, 0.0  ;;  %v150_v19 = vsel %vm59_vm0, %v2792_v15, 0.0 }
  0x4f   :  { %279 = vadd.xlane.f32.xlu1 %v278_v24  ;;  %276 = vadd.xlane.f32.xlu0 %v275_v25  ;;  %v308_v24 = vsel %vm59_vm0, %v218_v22, 0.0  ;;  %v305_v25 = vsel %vm59_vm0, %v217_v23, 0.0 }
  0x53   :  { %124 = vadd.xlane.f32.xlu1 %v123_v28  ;;  %121 = vadd.xlane.f32.xlu0 %v120_v29  ;;  %v220_v28 = vmul.f32 %v2787_v14, %v2787_v14  ;;  %v219_v29 = vmul.f32 %v2792_v15, %v2792_v15 }
  0x57   :  { %130 = vadd.xlane.f32.xlu1 %v129_v34  ;;  %127 = vadd.xlane.f32.xlu0 %v126_v35  ;;  %v314_v34 = vsel %vm59_vm0, %v220_v28, 0.0  ;;  %v311_v35 = vsel %vm59_vm0, %v219_v29, 0.0 }
  0x5b   :  { %285 = vadd.xlane.f32.xlu1 %v284_v40  ;;  %282 = vadd.xlane.f32.xlu0 %v281_v41 }
  0x5f   :  { %291 = vadd.xlane.f32.xlu1 %v290_v44  ;;  %288 = vadd.xlane.f32.xlu0 %v287_v45 }
  0x63   :  { %136 = vadd.xlane.f32.xlu1 %v135_v48  ;;  %133 = vadd.xlane.f32.xlu0 %v132_v51 }
  0x67   :  { %142 = vadd.xlane.f32.xlu1 %v141_v56  ;;  %139 = vadd.xlane.f32.xlu0 %v138_v57 }
  0x6b   :  { %297 = vadd.xlane.f32.xlu1 %v296_v60  ;;  %294 = vadd.xlane.f32.xlu0 %v293_v61 }
  0x6f   :  { %303 = vadd.xlane.f32.xlu1 %v302_v3  ;;  %300 = vadd.xlane.f32.xlu0 %v299_v4 }
  0x73   :  { %148 = vadd.xlane.f32.xlu1 %v147_v12  ;;  %145 = vadd.xlane.f32.xlu0 %v144_v13 }
  0x77   :  { %154 = vadd.xlane.f32.xlu1 %v153_v18  ;;  %151 = vadd.xlane.f32.xlu0 %v150_v19 }
  0x7b   :  { %309 = vadd.xlane.f32.xlu1 %v308_v24  ;;  %306 = vadd.xlane.f32.xlu0 %v305_v25 }
  0x7f   :  { %315 = vadd.xlane.f32.xlu1 %v314_v34  ;;  %312 = vadd.xlane.f32.xlu0 %v311_v35 }
  0x90   :  { %v68_v38 = vpop.xlane.xlu1 %67  ;;  %v62_v39 = vpop.xlane.xlu0 %61 }
  0x91   :  { %v2810_v42 = vmul.f32 0.03125, %v62_v39  ;;  %v2812_v44 = vmul.f32 0.03125, %v68_v38 }
  0x93   :  { %v349_v56 = vmul.f32 %v2810_v42, %v2810_v42  ;;  %v351_v62 = vmul.f32 %v2812_v44, %v2812_v44 }
  0x94   :  { %v71_v40 = vpop.xlane.xlu1 %70  ;;  %v65_v41 = vpop.xlane.xlu0 %64 }
  0x95   :  { %v158_v43 = vmul.f32 0.03125, %v65_v41  ;;  %v2814_v45 = vmul.f32 0.03125, %v71_v40 }
  0x97   :  { %v350_v57 = vmul.f32 %v158_v43, %v158_v43  ;;  %v352_v63 = vmul.f32 %v2814_v45, %v2814_v45 }
  0x98   :  { %v226_v48 = vpop.xlane.xlu1 %225  ;;  %v223_v51 = vpop.xlane.xlu0 %222 }
  0x99   :  { %v318_v58 = vmul.f32 0.03125, %v226_v48  ;;  %v317_v59 = vmul.f32 0.03125, %v223_v51 }
  0x9b   :  { %v382_v60 = vsub.f32 %v318_v58, %v350_v57  ;;  %v381_v61 = vsub.f32 %v317_v59, %v349_v56 }
  0x9c   :  { %v232_v3 = vpop.xlane.xlu1 %231  ;;  %v229_v4 = vpop.xlane.xlu0 %228 }
  0x9d   :  { %v414_v12 = vmax.f32 %v382_v60, 0.0  ;;  %v413_v13 = vmax.f32 %v381_v61, 0.0  ;;  %v320_v18 = vmul.f32 0.03125, %v232_v3  ;;  %v319_v19 = vmul.f32 0.03125, %v229_v4 }
  0x9e   :  { %v446_v3 = vsub.f32 %v2506_v5, %v158_v43  ;;  %v448_v43 = vsub.f32 %v2497_v2, %v2814_v45 }
  0x9f   :  { %v478_v22 = vadd.f32 1e-05, %v414_v12  ;;  %v477_v23 = vadd.f32 1e-05, %v413_v13  ;;  %v384_v24 = vsub.f32 %v320_v18, %v352_v63  ;;  %v383_v25 = vsub.f32 %v319_v19, %v351_v62 }
  0xa0   :  { %v77_v28 = vpop.xlane.xlu1 %76  ;;  %v74_v29 = vpop.xlane.xlu0 %73  ;;  %v445_v19 = vsub.f32 %v2492_v1, %v2810_v42 }
  0xa1   :  { %2316 = vrsqrt.f32 %v478_v22  ;;  %v416_v34 = vmax.f32 %v384_v24, 0.0  ;;  %v415_v35 = vmax.f32 %v383_v25, 0.0  ;;  %v2822_v48 = vmul.f32 0.03125, %v77_v28 }
  0xa2   :  { %2318 = vrsqrt.f32 %v477_v23  ;;  %v2824_v51 = vmul.f32 0.03125, %v74_v29 }
  0xa3   :  { %v480_v38 = vadd.f32 1e-05, %v416_v34  ;;  %v479_v39 = vadd.f32 1e-05, %v415_v35  ;;  %v354_v60 = vmul.f32 %v2822_v48, %v2822_v48 }
  0xa4   :  { %v83_v40 = vpop.xlane.xlu1 %82  ;;  %v80_v41 = vpop.xlane.xlu0 %79  ;;  %v353_v61 = vmul.f32 %v2824_v51, %v2824_v51 }
  0xa5   :  { %2320 = vrsqrt.f32 %v480_v38  ;;  %v2826_v56 = vmul.f32 0.03125, %v83_v40  ;;  %v2828_v57 = vmul.f32 0.03125, %v80_v41 }
  0xa6   :  { %2322 = vrsqrt.f32 %v479_v39 }
  0xa7   :  { %v356_v22 = vmul.f32 %v2826_v56, %v2826_v56  ;;  %v355_v23 = vmul.f32 %v2828_v57, %v2828_v57 }
  0xa8   :  { %v238_v58 = vpop.xlane.xlu1 %237  ;;  %v235_v59 = vpop.xlane.xlu0 %234 }
  0xa9   :  { %v322_v62 = vmul.f32 0.03125, %v238_v58  ;;  %v321_v63 = vmul.f32 0.03125, %v235_v59  ;;  %v447_v59 = vsub.f32 %v2487_v0, %v2812_v44 }
  0xab   :  { %v2317_v4 = vpop.eup %2316  ;;  %v386_v12 = vsub.f32 %v322_v62, %v354_v60  ;;  %v385_v13 = vsub.f32 %v321_v63, %v353_v61 }
  0xac   :  { %v2319_v18 = vpop.eup %2318  ;;  %v244_v24 = vpop.xlane.xlu1 %243  ;;  %v542_v28 = vmul.f32 %v2317_v4, %v446_v3 }
  0xad   :  { %v241_v25 = vpop.xlane.xlu0 %240  ;;  %v418_v29 = vmax.f32 %v386_v12, 0.0  ;;  %v417_v34 = vmax.f32 %v385_v13, 0.0  ;;  %v324_v35 = vmul.f32 0.03125, %v244_v24  ;;  %v541_v38 = vmul.f32 %v2319_v18, %v445_v19 }
  0xae   :  { %v323_v5 = vmul.f32 0.03125, %v241_v25 }
  0xaf   :  { %v2321_v39 = vpop.eup %2320  ;;  %v482_v40 = vadd.f32 1e-05, %v418_v29  ;;  %v481_v1 = vadd.f32 1e-05, %v417_v34  ;;  %v388_v42 = vsub.f32 %v324_v35, %v356_v22  ;;  %v573_v61 = vpack.c.bf16 %v542_v28, %v541_v38 }
  0xb0   :  { %v387_v41 = vsub.f32 %v323_v5, %v355_v23  ;;  %v2323_v58 = vpop.eup %2322  ;;  %v89_v60 = vpop.xlane.xlu1 %88  ;;  %v544_v63 = vmul.f32 %v2321_v39, %v448_v43  ;;  %v450_v5 = vsub.f32 %v2527_v16, %v2822_v48  ;;  %v452_v48 = vsub.f32 %v2541_v20, %v2826_v56 }
  0xb1   :  { %v86_v62 = vpop.xlane.xlu0 %85  ;;  %2324 = vrsqrt.f32 %v482_v40  ;;  %v420_v3 = vmax.f32 %v388_v42, 0.0  ;;  %2166 = vmatprep.mubr.msk.bf16.mxu0 %vm59_vm0, %v573_v61  ;;  %v543_v2 = vmul.f32 %v2323_v58, %v447_v59  ;;  %v2846_v22 = vmul.f32 0.03125, %v89_v60 }
  0xb2   :  { %v419_v4 = vmax.f32 %v387_v41, 0.0  ;;  %2326 = vrsqrt.f32 %v481_v1  ;;  %v2848_v0 = vmul.f32 0.03125, %v86_v62  ;;  %v449_v1 = vsub.f32 %v2532_v17, %v2824_v51 }
  0xb3   :  { %v484_v45 = vadd.f32 1e-05, %v420_v3  ;;  %v574_v18 = vpack.c.bf16 %v544_v63, %v543_v2  ;;  %v358_v28 = vmul.f32 %v2846_v22, %v2846_v22 }
  0xb4   :  { %v483_v12 = vadd.f32 1e-05, %v419_v4  ;;  %v95_v13 = vpop.xlane.xlu1 %94  ;;  %v357_v29 = vmul.f32 %v2848_v0, %v2848_v0 }
  0xb5   :  { %v92_v19 = vpop.xlane.xlu0 %91  ;;  %2328 = vrsqrt.f32 %v484_v45  ;;  %2167 = vmatmul.mubr.msk.bf16.vlgmr.msra.gmra.mrb[0].mxu0 %vm59_vm0, %v574_v18  ;;  %v2851_v44 = vmul.f32 0.03125, %v95_v13  ;;  %v451_v13 = vsub.f32 %v2546_v21, %v2828_v57 }
  0xb6   :  { %2330 = vrsqrt.f32 %v483_v12  ;;  %v2853_v23 = vmul.f32 0.03125, %v92_v19 }
  0xb7   :  { %v360_v42 = vmul.f32 %v2851_v44, %v2851_v44 }
  0xb8   :  { %v250_v24 = vpop.xlane.xlu1 %249  ;;  %v359_v41 = vmul.f32 %v2853_v23, %v2853_v23 }
  0xb9   :  { %v247_v25 = vpop.xlane.xlu0 %246  ;;  %v326_v34 = vmul.f32 0.03125, %v250_v24 }
  0xba   :  { %v325_v35 = vmul.f32 0.03125, %v247_v25 }
  0xbb   :  { %v2325_v43 = vpop.eup %2324  ;;  %v390_v38 = vsub.f32 %v326_v34, %v358_v28 }
  0xbc   :  { %v389_v39 = vsub.f32 %v325_v35, %v357_v29  ;;  %v2327_v40 = vpop.eup %2326  ;;  %v256_v58 = vpop.xlane.xlu1 %255  ;;  %v546_v60 = vmul.f32 %v2325_v43, %v450_v5 }
  0xbd   :  { %v253_v59 = vpop.xlane.xlu0 %252  ;;  %v422_v61 = vmax.f32 %v390_v38, 0.0  ;;  %v328_v63 = vmul.f32 0.03125, %v256_v58  ;;  %v545_v3 = vmul.f32 %v2327_v40, %v449_v1 }
  0xbe   :  { %v421_v62 = vmax.f32 %v389_v39, 0.0  ;;  %v327_v16 = vmul.f32 0.03125, %v253_v59 }
  0xbf   :  { %v2329_v4 = vpop.eup %2328  ;;  %v486_v2 = vadd.f32 1e-05, %v422_v61  ;;  %v392_v51 = vsub.f32 %v328_v63, %v360_v42  ;;  %v575_v19 = vpack.c.bf16 %v546_v60, %v545_v3  ;;  %v454_v60 = vsub.f32 %v2567_v32, %v2846_v22 }
  0xc0   :  { %v485_v17 = vadd.f32 1e-05, %v421_v62  ;;  %v391_v45 = vsub.f32 %v327_v16, %v359_v41  ;;  %v2331_v12 = vpop.eup %2330  ;;  %v101_v18 = vpop.xlane.xlu1 %100  ;;  %v548_v25 = vmul.f32 %v2329_v4, %v452_v48  ;;  %v453_v48 = vsub.f32 %v2572_v33, %v2848_v0 }
  0xc1   :  { %v98_v24 = vpop.xlane.xlu0 %97  ;;  %2332 = vrsqrt.f32 %v486_v2  ;;  %v424_v28 = vmax.f32 %v392_v51, 0.0  ;;  %2170 = vmatprep.mubr.msk.bf16.mxu0 %vm59_vm0, %v575_v19  ;;  %v547_v20 = vmul.f32 %v2331_v12, %v451_v13  ;;  %v2872_v38 = vmul.f32 0.03125, %v101_v18 }
  0xc2   :  { %v423_v29 = vmax.f32 %v391_v45, 0.0  ;;  %2334 = vrsqrt.f32 %v485_v17  ;;  %v2874_v21 = vmul.f32 0.03125, %v98_v24  ;;  %v456_v22 = vsub.f32 %v2581_v36, %v2851_v44 }
  0xc3   :  { %v488_v56 = vadd.f32 1e-05, %v424_v28  ;;  %v576_v5 = vpack.c.bf16 %v548_v25, %v547_v20  ;;  %v362_v42 = vmul.f32 %v2872_v38, %v2872_v38 }
  0xc4   :  { %v487_v34 = vadd.f32 1e-05, %v423_v29  ;;  %v107_v35 = vpop.xlane.xlu1 %106  ;;  %v361_v41 = vmul.f32 %v2874_v21, %v2874_v21  ;;  %v455_v29 = vsub.f32 %v2586_v37, %v2853_v23 }
  0xc5   :  { %v104_v43 = vpop.xlane.xlu0 %103  ;;  %2336 = vrsqrt.f32 %v488_v56  ;;  %2171 = vmatmul.mubr.msk.bf16.gmra.mrb[4].mxu0 %vm59_vm0, %v576_v5  ;;  %v2877_v57 = vmul.f32 0.03125, %v107_v35 }
  0xc6   :  { %2338 = vrsqrt.f32 %v487_v34  ;;  %v2879_v39 = vmul.f32 0.03125, %v104_v43 }
  0xc7   :  { %v364_v3 = vmul.f32 %v2877_v57, %v2877_v57 }
  0xc8   :  { %v262_v40 = vpop.xlane.xlu1 %261  ;;  %v363_v4 = vmul.f32 %v2879_v39, %v2879_v39 }
  0xc9   :  { %v259_v1 = vpop.xlane.xlu0 %258  ;;  %v330_v58 = vmul.f32 0.03125, %v262_v40 }
  0xca   :  { %v329_v59 = vmul.f32 0.03125, %v259_v1 }
  0xcb   :  { %v2333_v61 = vpop.eup %2332  ;;  %v394_v62 = vsub.f32 %v330_v58, %v362_v42 }
  0xcc   :  { %v393_v63 = vsub.f32 %v329_v59, %v361_v41  ;;  %v2335_v16 = vpop.eup %2334  ;;  %v268_v2 = vpop.xlane.xlu1 %267  ;;  %v550_v51 = vmul.f32 %v2333_v61, %v454_v60 }
  0xcd   :  { %v265_v17 = vpop.xlane.xlu0 %264  ;;  %v426_v45 = vmax.f32 %v394_v62, 0.0  ;;  %v332_v13 = vmul.f32 0.03125, %v268_v2  ;;  %v549_v18 = vmul.f32 %v2335_v16, %v453_v48 }
  0xce   :  { %v425_v12 = vmax.f32 %v393_v63, 0.0  ;;  %v331_v32 = vmul.f32 0.03125, %v265_v17 }
  0xcf   :  { %v2337_v19 = vpop.eup %2336  ;;  %v490_v24 = vadd.f32 1e-05, %v426_v45  ;;  %v396_v0 = vsub.f32 %v332_v13, %v364_v3  ;;  %v577_v56 = vpack.c.bf16 %v550_v51, %v549_v18  ;;  %v458_v3 = vsub.f32 %v2610_v49, %v2872_v38 }
  0xd0   :  { %v489_v33 = vadd.f32 1e-05, %v425_v12  ;;  %v395_v25 = vsub.f32 %v331_v32, %v363_v4  ;;  %v2339_v28 = vpop.eup %2338  ;;  %v113_v20 = vpop.xlane.xlu1 %112  ;;  %v552_v35 = vmul.f32 %v2337_v19, %v456_v22  ;;  %v457_v45 = vsub.f32 %v2615_v50, %v2874_v21 }
  0xd1   :  { %v110_v34 = vpop.xlane.xlu0 %109  ;;  %2340 = vrsqrt.f32 %v490_v24  ;;  %v428_v5 = vmax.f32 %v396_v0, 0.0  ;;  %2174 = vmatprep.mubr.msk.bf16.mxu0 %vm59_vm0, %v577_v56  ;;  %v551_v36 = vmul.f32 %v2339_v28, %v455_v29  ;;  %v2898_v58 = vmul.f32 0.03125, %v113_v20 }
  0xd2   :  { %v427_v43 = vmax.f32 %v395_v25, 0.0  ;;  %2342 = vrsqrt.f32 %v489_v33  ;;  %v2900_v37 = vmul.f32 0.03125, %v110_v34  ;;  %v460_v38 = vsub.f32 %v2627_v54, %v2877_v57 }
  0xd3   :  { %v492_v44 = vadd.f32 1e-05, %v428_v5  ;;  %v578_v42 = vpack.c.bf16 %v552_v35, %v551_v36  ;;  %v366_v62 = vmul.f32 %v2898_v58, %v2898_v58  ;;  %v459_v56 = vsub.f32 %v2632_v55, %v2879_v39 }
  0xd4   :  { %v491_v40 = vadd.f32 1e-05, %v427_v43  ;;  %v119_v1 = vpop.xlane.xlu1 %118  ;;  %v365_v63 = vmul.f32 %v2900_v37, %v2900_v37 }
  0xd5   :  { %v116_v41 = vpop.xlane.xlu0 %115  ;;  %2344 = vrsqrt.f32 %v492_v44  ;;  %2175 = vmatmul.mubr.msk.bf16.gmra.mrb[8].mxu0 %vm59_vm0, %v578_v42  ;;  %v2903_v23 = vmul.f32 0.03125, %v119_v1 }
  0xd6   :  { %2346 = vrsqrt.f32 %v491_v40  ;;  %v2905_v59 = vmul.f32 0.03125, %v116_v41 }
  0xd7   :  { %v368_v12 = vmul.f32 %v2903_v23, %v2903_v23 }
  0xd8   :  { %v274_v60 = vpop.xlane.xlu1 %273  ;;  %v367_v13 = vmul.f32 %v2905_v59, %v2905_v59 }
  0xd9   :  { %v271_v61 = vpop.xlane.xlu0 %270  ;;  %v334_v16 = vmul.f32 0.03125, %v274_v60 }
  0xda   :  { %v333_v48 = vmul.f32 0.03125, %v271_v61 }
  0xdb   :  { %v2341_v4 = vpop.eup %2340  ;;  %v398_v2 = vsub.f32 %v334_v16, %v366_v62 }
  0xdc   :  { %v397_v17 = vsub.f32 %v333_v48, %v365_v63  ;;  %v2343_v51 = vpop.eup %2342  ;;  %v280_v32 = vpop.xlane.xlu1 %279  ;;  %v554_v18 = vmul.f32 %v2341_v4, %v458_v3 }
  0xdd   :  { %v277_v22 = vpop.xlane.xlu0 %276  ;;  %v430_v19 = vmax.f32 %v398_v2, 0.0  ;;  %v336_v33 = vmul.f32 0.03125, %v280_v32  ;;  %v553_v0 = vmul.f32 %v2343_v51, %v457_v45  ;;  %v462_v2 = vsub.f32 %v2653_v6, %v2898_v58 }
  0xde   :  { %v429_v24 = vmax.f32 %v397_v17, 0.0  ;;  %v335_v49 = vmul.f32 0.03125, %v277_v22  ;;  %v461_v22 = vsub.f32 %v2658_v7, %v2900_v37  ;;  %v464_v58 = vsub.f32 %v2667_v10, %v2903_v23 }
  0xdf   :  { %v2345_v25 = vpop.eup %2344  ;;  %v494_v28 = vadd.f32 1e-05, %v430_v19  ;;  %v400_v21 = vsub.f32 %v336_v33, %v368_v12  ;;  %v579_v35 = vpack.c.bf16 %v554_v18, %v553_v0  ;;  %v463_v0 = vsub.f32 %v2672_v11, %v2905_v59 }
  0xe0   :  { %v493_v50 = vadd.f32 1e-05, %v429_v24  ;;  %v399_v29 = vsub.f32 %v335_v49, %v367_v13  ;;  %v2347_v20 = vpop.eup %2346  ;;  %v125_v34 = vpop.xlane.xlu1 %124  ;;  %v556_v43 = vmul.f32 %v2345_v25, %v460_v38 }
  0xe1   :  { %v122_v5 = vpop.xlane.xlu0 %121  ;;  %2348 = vrsqrt.f32 %v494_v28  ;;  %v432_v36 = vmax.f32 %v400_v21, 0.0  ;;  %2178 = vmatprep.mubr.msk.bf16.mxu0 %vm59_vm0, %v579_v35  ;;  %v555_v54 = vmul.f32 %v2347_v20, %v459_v56  ;;  %v2924_v1 = vmul.f32 0.03125, %v125_v34 }
  0xe2   :  { %v431_v44 = vmax.f32 %v399_v29, 0.0  ;;  %2350 = vrsqrt.f32 %v493_v50  ;;  %v2926_v42 = vmul.f32 0.03125, %v122_v5 }
  0xe3   :  { %v496_v57 = vadd.f32 1e-05, %v432_v36  ;;  %v580_v60 = vpack.c.bf16 %v556_v43, %v555_v54  ;;  %v370_v39 = vmul.f32 %v2924_v1, %v2924_v1 }
  0xe4   :  { %v495_v40 = vadd.f32 1e-05, %v431_v44  ;;  %v131_v41 = vpop.xlane.xlu1 %130  ;;  %v369_v61 = vmul.f32 %v2926_v42, %v2926_v42 }
  0xe5   :  { %v128_v55 = vpop.xlane.xlu0 %127  ;;  %2352 = vrsqrt.f32 %v496_v57  ;;  %2179 = vmatmul.mubr.msk.bf16.gmra.mrb[12].mxu0 %vm59_vm0, %v580_v60  ;;  %v2933_v62 = vmul.f32 0.03125, %v131_v41 }
  0xe6   :  { %2354 = vrsqrt.f32 %v495_v40  ;;  %v2935_v63 = vmul.f32 0.03125, %v128_v55 }
  0xe7   :  { %v372_v51 = vmul.f32 %v2933_v62, %v2933_v62 }
  0xe8   :  { %v286_v16 = vpop.xlane.xlu1 %285  ;;  %v371_v45 = vmul.f32 %v2935_v63, %v2935_v63 }
  0xe9   :  { %v283_v48 = vpop.xlane.xlu0 %282  ;;  %v338_v3 = vmul.f32 0.03125, %v286_v16 }
  0xea   :  { %v337_v4 = vmul.f32 0.03125, %v283_v48 }
  0xeb   :  { %v2349_v17 = vpop.eup %2348  ;;  %v402_v12 = vsub.f32 %v338_v3, %v370_v39  ;;  %v466_v3 = vsub.f32 %v2693_v26, %v2924_v1  ;;  %v468_v1 = vsub.f32 %v2707_v30, %v2933_v62 }
  0xec   :  { %v401_v13 = vsub.f32 %v337_v4, %v369_v61  ;;  %v2351_v32 = vpop.eup %2350  ;;  %v292_v18 = vpop.xlane.xlu1 %291  ;;  %v558_v24 = vmul.f32 %v2349_v17, %v462_v2  ;;  %v465_v2 = vsub.f32 %v2698_v27, %v2926_v42  ;;  %v467_v27 = vsub.f32 %v2712_v31, %v2935_v63 }
  0xed   :  { %v289_v19 = vpop.xlane.xlu0 %288  ;;  %v434_v33 = vmax.f32 %v402_v12, 0.0  ;;  %v340_v38 = vmul.f32 0.03125, %v292_v18  ;;  %v557_v25 = vmul.f32 %v2351_v32, %v461_v22 }
  0xee   :  { %v433_v49 = vmax.f32 %v401_v13, 0.0  ;;  %v339_v6 = vmul.f32 0.03125, %v289_v19 }
  0xef   :  { %v2353_v28 = vpop.eup %2352  ;;  %v498_v50 = vadd.f32 1e-05, %v434_v33  ;;  %v404_v29 = vsub.f32 %v340_v38, %v372_v51  ;;  %v581_v37 = vpack.c.bf16 %v558_v24, %v557_v25 }
  0xf0   :  { %v497_v21 = vadd.f32 1e-05, %v433_v49  ;;  %v403_v20 = vsub.f32 %v339_v6, %v371_v45  ;;  %v2355_v7 = vpop.eup %2354  ;;  %v560_v56 = vmul.f32 %v2353_v28, %v464_v58  ;;  %v137_v34 = vpop.xlane.xlu1 %136 }
  0xf1   :  { %v134_v35 = vpop.xlane.xlu0 %133  ;;  %2356 = vrsqrt.f32 %v498_v50  ;;  %v436_v5 = vmax.f32 %v404_v29, 0.0  ;;  %v559_v36 = vmul.f32 %v2355_v7, %v463_v0  ;;  %2182 = vmatprep.mubr.msk.bf16.mxu1 %vm59_vm0, %v581_v37  ;;  %v2950_v10 = vmul.f32 0.03125, %v137_v34 }
  0xf2   :  { %v435_v43 = vmax.f32 %v403_v20, 0.0  ;;  %2358 = vrsqrt.f32 %v497_v21  ;;  %v2952_v44 = vmul.f32 0.03125, %v134_v35 }
  0xf3   :  { %v500_v11 = vadd.f32 1e-05, %v436_v5  ;;  %v582_v59 = vpack.c.bf16 %v560_v56, %v559_v36  ;;  %v374_v40 = vmul.f32 %v2950_v10, %v2950_v10 }
  0xf4   :  { %v499_v23 = vadd.f32 1e-05, %v435_v43  ;;  %v143_v54 = vpop.xlane.xlu1 %142  ;;  %v373_v41 = vmul.f32 %v2952_v44, %v2952_v44 }
  0xf5   :  { %v140_v57 = vpop.xlane.xlu0 %139  ;;  %2360 = vrsqrt.f32 %v500_v11  ;;  %2183 = vmatmul.mubr.msk.bf16.vlgmr.msra.gmra.mrb[0].mxu1 %vm59_vm0, %v582_v59  ;;  %v2959_v60 = vmul.f32 0.03125, %v143_v54 }
  0xf6   :  { %2362 = vrsqrt.f32 %v499_v23  ;;  %v2961_v55 = vmul.f32 0.03125, %v140_v57  ;;  %v470_v23 = vsub.f32 %v2733_v46, %v2950_v10 }
  0xf7   :  { %v376_v17 = vmul.f32 %v2959_v60, %v2959_v60 }
  0xf8   :  { %v298_v39 = vpop.xlane.xlu1 %297  ;;  %v375_v32 = vmul.f32 %v2961_v55, %v2961_v55 }
  0xf9   :  { %v295_v61 = vpop.xlane.xlu0 %294  ;;  %v342_v16 = vmul.f32 0.03125, %v298_v39 }
  0xfa   :  { %v341_v48 = vmul.f32 0.03125, %v295_v61 }
  0xfb   :  { %v2357_v4 = vpop.eup %2356  ;;  %v406_v51 = vsub.f32 %v342_v16, %v374_v40 }
  0xfc   :  { %v405_v45 = vsub.f32 %v341_v48, %v373_v41  ;;  %v2359_v12 = vpop.eup %2358  ;;  %v562_v13 = vmul.f32 %v2357_v4, %v466_v3  ;;  %v304_v22 = vpop.xlane.xlu1 %303  ;;  %v469_v41 = vsub.f32 %v2738_v47, %v2952_v44 }
  0xfd   :  { %v301_v18 = vpop.xlane.xlu0 %300  ;;  %v561_v19 = vmul.f32 %v2359_v12, %v465_v2  ;;  %v438_v24 = vmax.f32 %v406_v51, 0.0  ;;  %v344_v26 = vmul.f32 0.03125, %v304_v22  ;;  %v472_v2 = vsub.f32 %v2747_v52, %v2959_v60 }
  0xfe   :  { %v437_v33 = vmax.f32 %v405_v45, 0.0  ;;  %v343_v42 = vmul.f32 0.03125, %v301_v18 }
  0xff   :  { %v2361_v49 = vpop.eup %2360  ;;  %v583_v38 = vpack.c.bf16 %v562_v13, %v561_v19  ;;  %v502_v6 = vadd.f32 1e-05, %v438_v24  ;;  %v408_v0 = vsub.f32 %v344_v26, %v376_v17  ;;  %v471_v17 = vsub.f32 %v2752_v53, %v2961_v55 }
 0x100   :  { %v501_v58 = vadd.f32 1e-05, %v437_v33  ;;  %v2363_v25 = vpop.eup %2362  ;;  %v564_v28 = vmul.f32 %v2361_v49, %v468_v1  ;;  %v407_v50 = vsub.f32 %v343_v42, %v375_v32  ;;  %v149_v21 = vpop.xlane.xlu1 %148 }
 0x101   :  { %v146_v29 = vpop.xlane.xlu0 %145  ;;  %2186 = vmatprep.mubr.msk.bf16.mxu1 %vm59_vm0, %v583_v38  ;;  %v563_v20 = vmul.f32 %v2363_v25, %v467_v27  ;;  %2364 = vrsqrt.f32 %v502_v6  ;;  %v440_v7 = vmax.f32 %v408_v0, 0.0  ;;  %v186_v63 = vmul.f32 0.03125, %v149_v21 }
 0x102   :  { %2366 = vrsqrt.f32 %v501_v58  ;;  %v439_v30 = vmax.f32 %v407_v50, 0.0  ;;  %v185_v37 = vmul.f32 0.03125, %v146_v29 }
 0x103   :  { %v584_v62 = vpack.c.bf16 %v564_v28, %v563_v20  ;;  %v504_v31 = vadd.f32 1e-05, %v440_v7  ;;  %v378_v5 = vmul.f32 %v186_v63, %v186_v63  ;;  %v474_v49 = vsub.f32 %v2773_v8, %v186_v63  ;;  %v2996_v8 = vld [vmem:[%s3724_s2] ss:$0 sm:$0xff] }
 0x104   :  { %v503_v56 = vadd.f32 1e-05, %v439_v30  ;;  %v155_v34 = vpop.xlane.xlu1 %154  ;;  %v377_v43 = vmul.f32 %v185_v37, %v185_v37  ;;  %v473_v38 = vsub.f32 %v2778_v9, %v185_v37 }
 0x105   :  { %v152_v35 = vpop.xlane.xlu0 %151  ;;  %2187 = vmatmul.mubr.msk.bf16.gmra.mrb[4].mxu1 %vm59_vm0, %v584_v62  ;;  %2368 = vrsqrt.f32 %v504_v31  ;;  %v188_v36 = vmul.f32 0.03125, %v155_v34 }
 0x106   :  { %2370 = vrsqrt.f32 %v503_v56  ;;  %v187_v11 = vmul.f32 0.03125, %v152_v35 }
 0x107   :  { %v380_v61 = vmul.f32 %v188_v36, %v188_v36  ;;  %v476_v0 = vsub.f32 %v2787_v14, %v188_v36 }
 0x108   :  { %v310_v59 = vpop.xlane.xlu1 %309  ;;  %v379_v16 = vmul.f32 %v187_v11, %v187_v11  ;;  %v475_v28 = vsub.f32 %v2792_v15, %v187_v11 }
 0x109   :  { %v307_v54 = vpop.xlane.xlu0 %306  ;;  %v346_v57 = vmul.f32 0.03125, %v310_v59 }
 0x10a   :  { %v345_v40 = vmul.f32 0.03125, %v307_v54 }
 0x10b   :  { %v2365_v39 = vpop.eup %2364  ;;  %v410_v48 = vsub.f32 %v346_v57, %v378_v5 }
 0x10c   :  { %v409_v3 = vsub.f32 %v345_v40, %v377_v43  ;;  %v2367_v4 = vpop.eup %2366  ;;  %v316_v46 = vpop.xlane.xlu1 %315  ;;  %v566_v51 = vmul.f32 %v2365_v39, %v470_v23 }
 0x10d   :  { %v313_v10 = vpop.xlane.xlu0 %312  ;;  %v442_v45 = vmax.f32 %v410_v48, 0.0  ;;  %v348_v13 = vmul.f32 0.03125, %v316_v46  ;;  %v565_v47 = vmul.f32 %v2367_v4, %v469_v41 }
 0x10e   :  { %v441_v12 = vmax.f32 %v409_v3, 0.0  ;;  %v347_v32 = vmul.f32 0.03125, %v313_v10 }
 0x10f   :  { %v2369_v44 = vpop.eup %2368  ;;  %v506_v22 = vadd.f32 1e-05, %v442_v45  ;;  %v412_v19 = vsub.f32 %v348_v13, %v380_v61  ;;  %v585_v26 = vpack.c.bf16 %v566_v51, %v565_v47 }
 0x110   :  { %v505_v18 = vadd.f32 1e-05, %v441_v12  ;;  %v411_v24 = vsub.f32 %v347_v32, %v379_v16  ;;  %v2371_v33 = vpop.eup %2370  ;;  %v568_v1 = vmul.f32 %v2369_v44, %v472_v2 }
 0x111   :  { %2372 = vrsqrt.f32 %v506_v22  ;;  %v444_v52 = vmax.f32 %v412_v19, 0.0  ;;  %v567_v53 = vmul.f32 %v2371_v33, %v471_v17  ;;  %2190 = vmatprep.mubr.msk.bf16.mxu1 %vm59_vm0, %v585_v26 }
 0x112   :  { %v443_v60 = vmax.f32 %v411_v24, 0.0  ;;  %2374 = vrsqrt.f32 %v505_v18 }
 0x113   :  { %v508_v55 = vadd.f32 1e-05, %v444_v52  ;;  %v586_v42 = vpack.c.bf16 %v568_v1, %v567_v53 }
 0x114   :  { %v507_v27 = vadd.f32 1e-05, %v443_v60 }
 0x115   :  { %2376 = vrsqrt.f32 %v508_v55  ;;  %2191 = vmatmul.mubr.msk.bf16.gmra.mrb[8].mxu1 %vm59_vm0, %v586_v42 }
 0x116   :  { %2378 = vrsqrt.f32 %v507_v27 }
 0x11b   :  { %v2373_v6 = vpop.eup %2372 }
 0x11c   :  { %v2375_v58 = vpop.eup %2374  ;;  %v570_v25 = vmul.f32 %v2373_v6, %v474_v49 }
 0x11d   :  { %v569_v50 = vmul.f32 %v2375_v58, %v473_v38 }
 0x11f   :  { %v2377_v21 = vpop.eup %2376  ;;  %v587_v29 = vpack.c.bf16 %v570_v25, %v569_v50 }
 0x120   :  { %v2379_v20 = vpop.eup %2378  ;;  %v572_v7 = vmul.f32 %v2377_v21, %v476_v0  ;;  %v2300_v0 = vld [vmem:[%s3725_s3] sm:$0xff]  }
 0x121   :  { %2194 = vmatprep.mubr.msk.bf16.mxu1 %vm59_vm0, %v587_v29  ;;  %v571_v30 = vmul.f32 %v2379_v20, %v475_v28  ;;  %2198 = vmatprep.subr.bf16.mxu1 %v2300_v0 }
 0x122   :  { %2199 = vmatpush3.bf16.msra.mxu1 %v2300_v0 }
 0x123   :  { %v588_v62 = vpack.c.bf16 %v572_v7, %v571_v30  ;;  %v2301_v30 = vld [vmem:[%s3725_s3 + $0x8] sm:$0xff]  }
 0x124   :  { %2200 = vmatprep.subr.bf16.mxu1 %v2301_v30 }
 0x125   :  { %2195 = vmatmul.mubr.msk.bf16.gmra.mrb[12].mxu1 %vm59_vm0, %v588_v62 }
 0x126   :  { %2201 = vmatpush3.bf16.msra.mxu1 %v2301_v30 }
 0x188   :  { %v2168_v9 = vpop.f32.mrb[0].mxu0 }
 0x189   :  { %v703_v14 = vadd.f32 %v2168_v9, %v2996_v8  ;;  %v694_v15 = vpop.f32.mrb[1].mxu0 }
 0x18a   :  { %v2169_v31 = vpop.f32.mrb[2].mxu0  ;;  %v695_v4 = vadd.f32 %v2996_v8, %v694_v15 }
 0x18b   :  { %v2999_v63 = vmax.f32 %v703_v14, 0.0  ;;  %v706_v37 = vadd.f32 %v2169_v31, %v2996_v8  ;;  %v697_v56 = vpop.f32.mrb[3].mxu0  ;;  %v2302_v31 = vld [vmem:[%s3725_s3 + $0x10] sm:$0xff]  }
 0x18c   :  { %v698_v10 = vadd.f32 %v2996_v8, %v697_v56  ;;  %v3035_v45 = vmax.f32 %v695_v4, 0.0  ;;  %2202 = vmatprep.subr.bf16.mxu1 %v2302_v31 }
 0x18d   :  { %v3002_v34 = vmax.f32 %v706_v37, 0.0  ;;  %857 = vadd.xlane.f32.xlu0 %v2999_v63  ;;  %v952_v22 = vmul.f32 %v2999_v63, %v2999_v63  ;;  %2203 = vmatpush3.bf16.msra.mxu1 %v2302_v31 }
 0x18e   :  { %v3039_v13 = vmax.f32 %v698_v10, 0.0  ;;  %v950_v60 = vmul.f32 %v3035_v45, %v3035_v45  ;;  %v2305_v10 = vld [vmem:[%s3725_s3 + $0x28] sm:$0xff]  }
 0x18f   :  { %859 = vadd.xlane.f32.xlu1 %v3002_v34  ;;  %v953_v24 = vmul.f32 %v3002_v34, %v3002_v34 }
 0x190   :  { %v951_v53 = vmul.f32 %v3039_v13, %v3039_v13 }
 0x198   :  { %v2172_v35 = vpop.f32.mrb[4].mxu0 }
 0x199   :  { %v3006_v5 = vpop.f32.mrb[5].mxu0  ;;  %v719_v55 = vadd.f32 %v2172_v35, %v2996_v8 }
 0x19a   :  { %v2173_v43 = vpop.f32.mrb[6].mxu0  ;;  %v711_v29 = vadd.f32 %v2996_v8, %v3006_v5  ;;  %v2303_v5 = vld [vmem:[%s3725_s3 + $0x18] sm:$0xff]  }
 0x19b   :  { %v3008_v36 = vpop.f32.mrb[7].mxu0  ;;  %v722_v42 = vadd.f32 %v2173_v43, %v2996_v8  ;;  %v3068_v38 = vmax.f32 %v719_v55, 0.0  ;;  %2204 = vmatprep.subr.bf16.mxu1 %v2303_v5 }
 0x19c   :  { %v714_v62 = vadd.f32 %v2996_v8, %v3008_v36  ;;  %v3099_v14 = vmax.f32 %v711_v29, 0.0  ;;  %2205 = vmatpush3.bf16.msra.mxu1 %v2303_v5 }
 0x19d   :  { %v3076_v25 = vmax.f32 %v722_v42, 0.0  ;;  %v956_v36 = vmul.f32 %v3068_v38, %v3068_v38 }
 0x19e   :  { %v3106_v37 = vmax.f32 %v714_v62, 0.0 }
 0x1a8   :  { %v3010_v11 = vpop.f32.mrb[8].mxu0 }
 0x1a9   :  { %v3012_v23 = vpop.f32.mrb[9].mxu0 }
 0x1aa   :  { %v3014_v59 = vpop.f32.mrb[10].mxu0 }
 0x1ab   :  { %v3016_v54 = vpop.f32.mrb[11].mxu0 }
 0x1b8   :  { %v3018_v57 = vpop.f32.mrb[12].mxu0 }
 0x1b9   :  { %v3020_v40 = vpop.f32.mrb[13].mxu0 }
 0x1ba   :  { %v3022_v41 = vpop.f32.mrb[14].mxu0 }
 0x1bb   :  { %v3024_v39 = vpop.f32.mrb[15].mxu0 }
 0x1c8   :  { %v2184_v61 = vpop.f32.mrb[0].mxu1 }
 0x1c9   :  { %v767_v16 = vadd.f32 %v2184_v61, %v2996_v8  ;;  %v758_v48 = vpop.f32.mrb[1].mxu1 }
 0x1ca   :  { %v2185_v3 = vpop.f32.mrb[2].mxu1  ;;  %v759_v12 = vadd.f32 %v2996_v8, %v758_v48  ;;  %v957_v48 = vmul.f32 %v3076_v25, %v3076_v25 }
 0x1cb   :  { %v3028_v2 = vmax.f32 %v767_v16, 0.0  ;;  %v770_v17 = vadd.f32 %v2185_v3, %v2996_v8  ;;  %v761_v46 = vpop.f32.mrb[3].mxu1  ;;  %v2304_v16 = vld [vmem:[%s3725_s3 + $0x20] sm:$0xff]  }
 0x1cc   :  { %v762_v32 = vadd.f32 %v2996_v8, %v761_v46  ;;  %v3043_v47 = vmax.f32 %v759_v12, 0.0  ;;  %2206 = vmatprep.subr.bf16.mxu1 %v2304_v16  ;;  %v955_v12 = vmul.f32 %v3106_v37, %v3106_v37 }
 0x1cd   :  { %v3032_v51 = vmax.f32 %v770_v17, 0.0  ;;  %889 = vadd.xlane.f32.xlu0 %v3028_v2  ;;  %v968_v1 = vmul.f32 %v3028_v2, %v3028_v2  ;;  %v954_v17 = vmul.f32 %v3099_v14, %v3099_v14  ;;  %2207 = vmatpush3.bf16.msra.mxu1 %v2304_v16 }
 0x1ce   :  { %v3046_v44 = vmax.f32 %v762_v32, 0.0  ;;  %v966_v27 = vmul.f32 %v3043_v47, %v3043_v47  ;;  %2208 = vmatprep.subr.bf16.mxu1 %v2305_v10  ;;  %v735_v32 = vadd.f32 %v3010_v11, %v2996_v8  ;;  %v727_v11 = vadd.f32 %v2996_v8, %v3012_v23 }
 0x1cf   :  { %891 = vadd.xlane.f32.xlu1 %v3032_v51  ;;  %v969_v52 = vmul.f32 %v3032_v51, %v3032_v51 }
 0x1d0   :  { %v967_v49 = vmul.f32 %v3046_v44, %v3046_v44 }
 0x1d1   :  { %853 = vadd.xlane.f32.xlu0 %v3035_v45  ;;  %2209 = vmatpush3.bf16.msra.mxu1 %v2305_v10 }
 0x1d3   :  { %855 = vadd.xlane.f32.xlu1 %v3039_v13 }
 0x1d5   :  { %885 = vadd.xlane.f32.xlu0 %v3043_v47 }
 0x1d7   :  { %887 = vadd.xlane.f32.xlu1 %v3046_v44 }
 0x1d8   :  { %v2188_v18 = vpop.f32.mrb[4].mxu1 }
 0x1d9   :  { %986 = vadd.xlane.f32.xlu0 %v952_v22  ;;  %v774_v19 = vpop.f32.mrb[5].mxu1  ;;  %v783_v6 = vadd.f32 %v2188_v18, %v2996_v8  ;;  %v2306_v18 = vld [vmem:[%s3725_s3 + $0x30] sm:$0xff]  }
 0x1da   :  { %v2189_v33 = vpop.f32.mrb[6].mxu1  ;;  %v775_v15 = vadd.f32 %v2996_v8, %v774_v19  ;;  %v738_v19 = vadd.f32 %v3014_v59, %v2996_v8  ;;  %2210 = vmatprep.subr.bf16.mxu1 %v2306_v18  ;;  %v730_v59 = vadd.f32 %v2996_v8, %v3016_v54 }
 0x1db   :  { %988 = vadd.xlane.f32.xlu1 %v953_v24  ;;  %v777_v26 = vpop.f32.mrb[7].mxu1  ;;  %v786_v28 = vadd.f32 %v2189_v33, %v2996_v8  ;;  %v3086_v20 = vmax.f32 %v783_v6, 0.0  ;;  %v3153_v33 = vmax.f32 %v735_v32, 0.0  ;;  %2211 = vmatpush3.bf16.msra.mxu1 %v2306_v18  ;;  %v743_v6 = vadd.f32 %v2996_v8, %v3020_v40 }
 0x1dc   :  { %v778_v56 = vadd.f32 %v2996_v8, %v777_v26  ;;  %v3110_v35 = vmax.f32 %v775_v15, 0.0  ;;  %v2307_v26 = vld [vmem:[%s3725_s3 + $0x38] sm:$0xff]   ;;  %v3168_v23 = vmax.f32 %v730_v59, 0.0 }
 0x1dd   :  { %1018 = vadd.xlane.f32.xlu0 %v968_v1  ;;  %v3096_v9 = vmax.f32 %v786_v28, 0.0  ;;  %v3160_v1 = vmax.f32 %v738_v19, 0.0  ;;  %2212 = vmatprep.subr.bf16.mxu1 %v2307_v26  ;;  %v3193_v28 = vmax.f32 %v743_v6, 0.0  ;;  %v972_v15 = vmul.f32 %v3086_v20, %v3086_v20 }
 0x1de   :  { %v3116_v43 = vmax.f32 %v778_v56, 0.0  ;;  %v970_v22 = vmul.f32 %v3110_v35, %v3110_v35  ;;  %v959_v42 = vmul.f32 %v3168_v23, %v3168_v23 }
 0x1df   :  { %1020 = vadd.xlane.f32.xlu1 %v969_v52  ;;  %v3165_v52 = vmax.f32 %v727_v11, 0.0  ;;  %2213 = vmatpush3.bf16.msra.mxu1 %v2307_v26  ;;  %v961_v54 = vmul.f32 %v3160_v1, %v3160_v1  ;;  %v973_v56 = vmul.f32 %v3096_v9, %v3096_v9 }
 0x1e0   :  { %v971_v24 = vmul.f32 %v3116_v43, %v3116_v43 }
 0x1e1   :  { %982 = vadd.xlane.f32.xlu0 %v950_v60  ;;  %v960_v60 = vmul.f32 %v3153_v33, %v3153_v33  ;;  %v958_v55 = vmul.f32 %v3165_v52, %v3165_v52 }
 0x1e3   :  { %984 = vadd.xlane.f32.xlu1 %v951_v53  ;;  %v751_v53 = vadd.f32 %v3018_v57, %v2996_v8  ;;  %v746_v57 = vadd.f32 %v2996_v8, %v3024_v39  ;;  %v962_v39 = vmul.f32 %v3193_v28, %v3193_v28 }
 0x1e5   :  { %1014 = vadd.xlane.f32.xlu0 %v966_v27  ;;  %v754_v27 = vadd.f32 %v3022_v41, %v2996_v8  ;;  %v3196_v41 = vmax.f32 %v746_v57, 0.0 }
 0x1e7   :  { %1016 = vadd.xlane.f32.xlu1 %v967_v49  ;;  %v3184_v49 = vmax.f32 %v751_v53, 0.0  ;;  %v3188_v0 = vmax.f32 %v754_v27, 0.0  ;;  %v963_v30 = vmul.f32 %v3196_v41, %v3196_v41 }
 0x1e8   :  { %v3071_v58 = vpop.f32.mrb[8].mxu1 }
 0x1e9   :  { %865 = vadd.xlane.f32.xlu0 %v3068_v38  ;;  %v3080_v50 = vpop.f32.mrb[9].mxu1  ;;  %v964_v40 = vmul.f32 %v3184_v49, %v3184_v49  ;;  %v965_v29 = vmul.f32 %v3188_v0, %v3188_v0  ;;  %v799_v5 = vadd.f32 %v3071_v58, %v2996_v8 }
 0x1ea   :  { %v3082_v21 = vpop.f32.mrb[10].mxu1  ;;  %v791_v62 = vadd.f32 %v2996_v8, %v3080_v50 }
 0x1eb   :  { %867 = vadd.xlane.f32.xlu1 %v3076_v25  ;;  %v3089_v7 = vpop.f32.mrb[11].mxu1  ;;  %v802_v50 = vadd.f32 %v3082_v21, %v2996_v8 }
 0x1ec   :  { %v794_v31 = vadd.f32 %v2996_v8, %v3089_v7 }
 0x1ed   :  { %897 = vadd.xlane.f32.xlu0 %v3086_v20  ;;  %v3228_v7 = vmax.f32 %v802_v50, 0.0 }
 0x1ee   :  { %v3222_v16 = vmax.f32 %v794_v31, 0.0 }
 0x1ef   :  { %899 = vadd.xlane.f32.xlu1 %v3096_v9  ;;  %v977_v32 = vmul.f32 %v3228_v7, %v3228_v7 }
 0x1f0   :  { %v975_v21 = vmul.f32 %v3222_v16, %v3222_v16 }
 0x1f1   :  { %861 = vadd.xlane.f32.xlu0 %v3099_v14 }
 0x1f3   :  { %863 = vadd.xlane.f32.xlu1 %v3106_v37 }
 0x1f5   :  { %893 = vadd.xlane.f32.xlu0 %v3110_v35 }
 0x1f7   :  { %895 = vadd.xlane.f32.xlu1 %v3116_v43 }
 0x1f8   :  { %v3122_v61 = vpop.f32.mrb[12].mxu1 }
 0x1f9   :  { %994 = vadd.xlane.f32.xlu0 %v956_v36  ;;  %v3129_v3 = vpop.f32.mrb[13].mxu1  ;;  %v3218_v36 = vmax.f32 %v791_v62, 0.0 }
 0x1fa   :  { %v3131_v4 = vpop.f32.mrb[14].mxu1 }
 0x1fb   :  { %996 = vadd.xlane.f32.xlu1 %v957_v48  ;;  %v3135_v46 = vpop.f32.mrb[15].mxu1  ;;  %v3225_v48 = vmax.f32 %v799_v5, 0.0  ;;  %v974_v58 = vmul.f32 %v3218_v36, %v3218_v36 }
 0x1fd   :  { %990 = vadd.xlane.f32.xlu0 %v954_v17  ;;  %v807_v17 = vadd.f32 %v2996_v8, %v3129_v3  ;;  %v976_v10 = vmul.f32 %v3225_v48, %v3225_v48  ;;  %v818_v3 = vadd.f32 %v3131_v4, %v2996_v8 }
 0x1ff   :  { %992 = vadd.xlane.f32.xlu1 %v955_v12  ;;  %v810_v12 = vadd.f32 %v2996_v8, %v3135_v46  ;;  %v3246_v18 = vmax.f32 %v807_v17, 0.0  ;;  %v3256_v46 = vmax.f32 %v818_v3, 0.0 }
 0x201   :  { %1022 = vadd.xlane.f32.xlu0 %v970_v22  ;;  %v815_v22 = vadd.f32 %v3122_v61, %v2996_v8  ;;  %v3250_v19 = vmax.f32 %v810_v12, 0.0  ;;  %3731 = vst [vmem:[#allocation2_spill] sm:$0xff] %v3256_v46  ;;  %v978_v61 = vmul.f32 %v3246_v18, %v3246_v18  ;;  %v981_v11 = vmul.f32 %v3256_v46, %v3256_v46 }
 0x203   :  { %1024 = vadd.xlane.f32.xlu1 %v971_v24  ;;  %v3253_v24 = vmax.f32 %v815_v22, 0.0  ;;  %v979_v8 = vmul.f32 %v3250_v19, %v3250_v19 }
 0x205   :  { %873 = vadd.xlane.f32.xlu0 %v3153_v33  ;;  %v980_v4 = vmul.f32 %v3253_v24, %v3253_v24 }
 0x207   :  { %875 = vadd.xlane.f32.xlu1 %v3160_v1 }
 0x209   :  { %869 = vadd.xlane.f32.xlu0 %v3165_v52 }
 0x20b   :  { %871 = vadd.xlane.f32.xlu1 %v3168_v23 }
 0x20d   :  { %1002 = vadd.xlane.f32.xlu0 %v960_v60 }
 0x20f   :  { %1004 = vadd.xlane.f32.xlu1 %v961_v54 }
 0x211   :  { %998 = vadd.xlane.f32.xlu0 %v958_v55 }
 0x213   :  { %1000 = vadd.xlane.f32.xlu1 %v959_v42 }
 0x215   :  { %881 = vadd.xlane.f32.xlu0 %v3184_v49 }
 0x217   :  { %883 = vadd.xlane.f32.xlu1 %v3188_v0 }
 0x219   :  { %877 = vadd.xlane.f32.xlu0 %v3193_v28 }
 0x21a   :  { %v858_v26 = vpop.xlane.xlu0 %857 }
 0x21b   :  { %879 = vadd.xlane.f32.xlu1 %v3196_v41  ;;  %v3268_v42 = vmul.f32 0.0078125, %v858_v26 }
 0x21c   :  { %v860_v59 = vpop.xlane.xlu1 %859 }
 0x21d   :  { %1010 = vadd.xlane.f32.xlu0 %v964_v40  ;;  %v3270_v57 = vmul.f32 0.0078125, %v860_v59 }
 0x21f   :  { %1012 = vadd.xlane.f32.xlu1 %v965_v29  ;;  %v1080_v29 = vmul.f32 %v3268_v42, %v3268_v42  ;;  %v1081_v31 = vmul.f32 %v3270_v57, %v3270_v57 }
 0x221   :  { %1006 = vadd.xlane.f32.xlu0 %v962_v39 }
 0x223   :  { %1008 = vadd.xlane.f32.xlu1 %v963_v30 }
 0x225   :  { %1026 = vadd.xlane.f32.xlu0 %v972_v15 }
 0x227   :  { %1028 = vadd.xlane.f32.xlu1 %v973_v56 }
 0x229   :  { %901 = vadd.xlane.f32.xlu0 %v3218_v36 }
 0x22b   :  { %903 = vadd.xlane.f32.xlu1 %v3222_v16 }
 0x22d   :  { %905 = vadd.xlane.f32.xlu0 %v3225_v48 }
 0x22f   :  { %907 = vadd.xlane.f32.xlu1 %v3228_v7 }
 0x231   :  { %1030 = vadd.xlane.f32.xlu0 %v974_v58 }
 0x233   :  { %1032 = vadd.xlane.f32.xlu1 %v975_v21 }
 0x235   :  { %1034 = vadd.xlane.f32.xlu0 %v976_v10 }
 0x237   :  { %1036 = vadd.xlane.f32.xlu1 %v977_v32 }
 0x239   :  { %909 = vadd.xlane.f32.xlu0 %v3246_v18 }
 0x23b   :  { %911 = vadd.xlane.f32.xlu1 %v3250_v19 }
 0x23d   :  { %913 = vadd.xlane.f32.xlu0 %v3253_v24 }
 0x23f   :  { %915 = vadd.xlane.f32.xlu1 %v3256_v46 }
 0x241   :  { %1038 = vadd.xlane.f32.xlu0 %v978_v61 }
 0x243   :  { %1040 = vadd.xlane.f32.xlu1 %v979_v8 }
 0x245   :  { %1042 = vadd.xlane.f32.xlu0 %v980_v4 }
 0x247   :  { %1044 = vadd.xlane.f32.xlu1 %v981_v11 }
 0x25a   :  { %v890_v60 = vpop.xlane.xlu0 %889 }
 0x25b   :  { %v3274_v39 = vmul.f32 0.0078125, %v890_v60  ;;  %v2308_v60 = vld [vmem:[%s3726_s5] sm:$0xff]  }
 0x25c   :  { %v892_v54 = vpop.xlane.xlu1 %891  ;;  %2246 = vmatprep.subr.bf16.mxu0 %v2308_v60 }
 0x25d   :  { %v3276_v62 = vmul.f32 0.0078125, %v892_v54  ;;  %v1096_v58 = vmul.f32 %v3274_v39, %v3274_v39  ;;  %2247 = vmatpush3.bf16.msra.mxu0 %v2308_v60 }
 0x25e   :  { %v854_v53 = vpop.xlane.xlu0 %853 }
 0x25f   :  { %v1097_v12 = vmul.f32 %v3276_v62, %v3276_v62  ;;  %v3284_v32 = vmul.f32 0.0078125, %v854_v53  ;;  %v2309_v53 = vld [vmem:[%s3726_s5 + $0x8] sm:$0xff]  }
 0x260   :  { %v856_v55 = vpop.xlane.xlu1 %855  ;;  %2248 = vmatprep.subr.bf16.mxu0 %v2309_v53 }
 0x261   :  { %v3286_v22 = vmul.f32 0.0078125, %v856_v55  ;;  %v1078_v55 = vmul.f32 %v3284_v32, %v3284_v32  ;;  %2249 = vmatpush3.bf16.msra.mxu0 %v2309_v53 }
 0x262   :  { %v886_v27 = vpop.xlane.xlu0 %885 }
 0x263   :  { %v3288_v26 = vmul.f32 0.0078125, %v886_v27 }
 0x264   :  { %v888_v6 = vpop.xlane.xlu1 %887 }
 0x266   :  { %v987_v40 = vpop.xlane.xlu0 %986 }
 0x267   :  { %v1048_v30 = vmul.f32 0.0078125, %v987_v40 }
 0x268   :  { %v989_v15 = vpop.xlane.xlu1 %988 }
 0x269   :  { %v1112_v56 = vsub.f32 %v1048_v30, %v1080_v29  ;;  %v1049_v5 = vmul.f32 0.0078125, %v989_v15  ;;  %v3298_v30 = vmul.f32 0.0078125, %v888_v6  ;;  %v2310_v6 = vld [vmem:[%s3726_s5 + $0x10] sm:$0xff]  }
 0x26a   :  { %v1019_v50 = vpop.xlane.xlu0 %1018  ;;  %2250 = vmatprep.subr.bf16.mxu0 %v2310_v6 }
 0x26b   :  { %v1144_v21 = vmax.f32 %v1112_v56, 0.0  ;;  %v1113_v17 = vsub.f32 %v1049_v5, %v1081_v31  ;;  %v1064_v10 = vmul.f32 0.0078125, %v1019_v50  ;;  %v1079_v31 = vmul.f32 %v3286_v22, %v3286_v22  ;;  %2251 = vmatpush3.bf16.msra.mxu0 %v2310_v6 }
 0x26c   :  { %v1021_v3 = vpop.xlane.xlu1 %1020  ;;  %v1193_v6 = vsub.f32 %v3032_v51, %v3276_v62  ;;  %v1174_v51 = vsub.f32 %v3035_v45, %v3284_v32  ;;  %v1175_v62 = vsub.f32 %v3039_v13, %v3286_v22  ;;  %v1190_v22 = vsub.f32 %v3043_v47, %v3288_v26 }
 0x26d   :  { %v1208_v61 = vadd.f32 1e-05, %v1144_v21  ;;  %v1145_v8 = vmax.f32 %v1113_v17, 0.0  ;;  %v1128_v4 = vsub.f32 %v1064_v10, %v1096_v58  ;;  %v1065_v11 = vmul.f32 0.0078125, %v1021_v3 }
 0x26e   :  { %v983_v59 = vpop.xlane.xlu0 %982  ;;  %v1094_v58 = vmul.f32 %v3288_v26, %v3288_v26 }
 0x26f   :  { %v1209_v54 = vadd.f32 1e-05, %v1145_v8  ;;  %v1160_v40 = vmax.f32 %v1128_v4, 0.0  ;;  %v1129_v29 = vsub.f32 %v1065_v11, %v1097_v12  ;;  %v1046_v15 = vmul.f32 0.0078125, %v983_v59  ;;  %v2311_v59 = vld [vmem:[%s3726_s5 + $0x18] sm:$0xff]  }
 0x270   :  { %v985_v27 = vpop.xlane.xlu1 %984  ;;  %v1095_v8 = vmul.f32 %v3298_v30, %v3298_v30  ;;  %2252 = vmatprep.subr.bf16.mxu0 %v2311_v59 }
 0x271   :  { %v1224_v56 = vadd.f32 1e-05, %v1160_v40  ;;  %v1161_v5 = vmax.f32 %v1129_v29, 0.0  ;;  %v1047_v50 = vmul.f32 0.0078125, %v985_v27  ;;  %v1110_v21 = vsub.f32 %v1046_v15, %v1078_v55  ;;  %2253 = vmatpush3.bf16.msra.mxu0 %v2311_v59 }
 0x272   :  { %v1015_v17 = vpop.xlane.xlu0 %1014  ;;  %v1177_v59 = vsub.f32 %v3002_v34, %v3270_v57 }
 0x273   :  { %2380 = vrsqrt.f32 %v1224_v56  ;;  %v1225_v10 = vadd.f32 1e-05, %v1161_v5  ;;  %v1111_v12 = vsub.f32 %v1047_v50, %v1079_v31  ;;  %v1062_v3 = vmul.f32 0.0078125, %v1015_v17 }
 0x274   :  { %v1142_v4 = vmax.f32 %v1110_v21, 0.0  ;;  %v1017_v11 = vpop.xlane.xlu1 %1016 }
 0x275   :  { %2382 = vrsqrt.f32 %v1225_v10  ;;  %v1143_v60 = vmax.f32 %v1111_v12, 0.0  ;;  %v1126_v40 = vsub.f32 %v1062_v3, %v1094_v58  ;;  %v1063_v29 = vmul.f32 0.0078125, %v1017_v11 }
 0x276   :  { %2384 = vrsqrt.f32 %v1209_v54  ;;  %v1206_v55 = vadd.f32 1e-05, %v1142_v4  ;;  %v866_v15 = vpop.xlane.xlu0 %865  ;;  %v2312_v54 = vld [vmem:[%s3726_s5 + $0x20] sm:$0xff]  }
 0x277   :  { %2386 = vrsqrt.f32 %v1208_v61  ;;  %v1207_v27 = vadd.f32 1e-05, %v1143_v60  ;;  %v1158_v31 = vmax.f32 %v1126_v40, 0.0  ;;  %v1127_v56 = vsub.f32 %v1063_v29, %v1095_v8  ;;  %2254 = vmatprep.subr.bf16.mxu0 %v2312_v54  ;;  %v2313_v8 = vld [vmem:[%s3726_s5 + $0x28] sm:$0xff]  }
 0x278   :  { %2388 = vrsqrt.f32 %v1206_v55  ;;  %v868_v5 = vpop.xlane.xlu1 %867  ;;  %v1192_v61 = vsub.f32 %v3028_v2, %v3274_v39  ;;  %2255 = vmatpush3.bf16.msra.mxu0 %v2312_v54  ;;  %v1191_v54 = vsub.f32 %v3046_v44, %v3298_v30 }
 0x279   :  { %2390 = vrsqrt.f32 %v1207_v27  ;;  %v1222_v50 = vadd.f32 1e-05, %v1158_v31  ;;  %v1159_v21 = vmax.f32 %v1127_v56, 0.0  ;;  %2256 = vmatprep.subr.bf16.mxu0 %v2313_v8  ;;  %v1176_v31 = vsub.f32 %v2999_v63, %v3268_v42 }
 0x27a   :  { %v3312_v17 = vpop.xlane.xlu0 %897  ;;  %v3342_v56 = vmul.f32 0.0078125, %v866_v15 }
 0x27b   :  { %2392 = vrsqrt.f32 %v1222_v50  ;;  %v1223_v53 = vadd.f32 1e-05, %v1159_v21  ;;  %v3346_v21 = vmul.f32 0.0078125, %v868_v5 }
 0x27c   :  { %v3319_v58 = vpop.xlane.xlu1 %899  ;;  %2257 = vmatpush3.bf16.msra.mxu0 %v2313_v8  ;;  %v1084_v15 = vmul.f32 %v3342_v56, %v3342_v56 }
 0x27d   :  { %v2381_v10 = vpop.eup %2380  ;;  %2394 = vrsqrt.f32 %v1223_v53  ;;  %v1085_v44 = vmul.f32 %v3346_v21, %v3346_v21 }
 0x27e   :  { %v862_v12 = vpop.xlane.xlu0 %861  ;;  %v3323_v3 = vmul.f32 %v2381_v10, %v1192_v61 }
 0x27f   :  { %v2383_v4 = vpop.eup %2382  ;;  %v3354_v61 = vmul.f32 0.0078125, %v862_v12 }
 0x280   :  { %v2385_v11 = vpop.eup %2384  ;;  %v864_v60 = vpop.xlane.xlu1 %863  ;;  %v3328_v2 = vmul.f32 %v2383_v4, %v1193_v6 }
 0x281   :  { %v2387_v39 = vpop.eup %2386  ;;  %v1273_v34 = vmul.f32 %v2385_v11, %v1177_v59  ;;  %v3356_v5 = vmul.f32 0.0078125, %v864_v60  ;;  %v1082_v60 = vmul.f32 %v3354_v61, %v3354_v61 }
 0x282   :  { %v2389_v40 = vpop.eup %2388  ;;  %v3336_v29 = vpop.xlane.xlu0 %893  ;;  %v1272_v13 = vmul.f32 %v2387_v39, %v1176_v31 }
 0x283   :  { %v2391_v27 = vpop.eup %2390  ;;  %v1270_v50 = vmul.f32 %v2389_v40, %v1174_v51  ;;  %v1083_v51 = vmul.f32 %v3356_v5, %v3356_v5 }
 0x284   :  { %v3344_v57 = vpop.xlane.xlu1 %895  ;;  %v1271_v45 = vmul.f32 %v2391_v27, %v1175_v62  ;;  %v1303_v6 = vpack.c.bf16 %v1273_v34, %v1272_v13 }
 0x285   :  { %v2393_v32 = vpop.eup %2392 }
 0x286   :  { %v995_v53 = vpop.xlane.xlu0 %994  ;;  %v1302_v63 = vpack.c.bf16 %v1271_v45, %v1270_v50  ;;  %v3358_v8 = vmul.f32 %v2393_v32, %v1190_v22 }
 0x287   :  { %v2395_v42 = vpop.eup %2394  ;;  %v1052_v10 = vmul.f32 0.0078125, %v995_v53 }
 0x288   :  { %v997_v4 = vpop.xlane.xlu1 %996  ;;  %2214 = vmatprep.mubr.bf16.mxu1 %v1302_v63  ;;  %v3360_v47 = vmul.f32 %v2395_v42, %v1191_v54 }
 0x289   :  { %v1116_v26 = vsub.f32 %v1052_v10, %v1084_v15  ;;  %v1053_v30 = vmul.f32 0.0078125, %v997_v4  ;;  %2215 = vmatmul.mubr.bf16.vlgmr.msra.gmra.mrb[16].mxu1 %v1303_v6 }
 0x28a   :  { %v991_v11 = vpop.xlane.xlu0 %990 }
 0x28b   :  { %v1148_v39 = vmax.f32 %v1116_v26, 0.0  ;;  %v1117_v59 = vsub.f32 %v1053_v30, %v1085_v44  ;;  %v1050_v40 = vmul.f32 0.0078125, %v991_v11 }
 0x28c   :  { %v993_v62 = vpop.xlane.xlu1 %992 }
 0x28d   :  { %v1212_v27 = vadd.f32 1e-05, %v1148_v39  ;;  %v1149_v31 = vmax.f32 %v1117_v59, 0.0  ;;  %v1114_v34 = vsub.f32 %v1050_v40, %v1082_v60  ;;  %v1051_v50 = vmul.f32 0.0078125, %v993_v62 }
 0x28e   :  { %v3370_v45 = vpop.xlane.xlu0 %1022 }
 0x28f   :  { %v1213_v32 = vadd.f32 1e-05, %v1149_v31  ;;  %v1146_v13 = vmax.f32 %v1114_v34, 0.0  ;;  %v1115_v22 = vsub.f32 %v1051_v50, %v1083_v51  ;;  %2396 = vrsqrt.f32 %v1212_v27 }
 0x290   :  { %v3372_v54 = vpop.xlane.xlu1 %1024  ;;  %v1181_v31 = vsub.f32 %v3076_v25, %v3346_v21 }
 0x291   :  { %v1210_v53 = vadd.f32 1e-05, %v1146_v13  ;;  %v1147_v63 = vmax.f32 %v1115_v22, 0.0  ;;  %2398 = vrsqrt.f32 %v1213_v32  ;;  %v1180_v13 = vsub.f32 %v3068_v38, %v3342_v56 }
 0x292   :  { %v874_v42 = vpop.xlane.xlu0 %873  ;;  %v1178_v22 = vsub.f32 %v3099_v14, %v3354_v61 }
 0x293   :  { %2400 = vrsqrt.f32 %v1210_v53  ;;  %v1211_v15 = vadd.f32 1e-05, %v1147_v63  ;;  %v3374_v4 = vmul.f32 0.0078125, %v874_v42  ;;  %v1179_v53 = vsub.f32 %v3106_v37, %v3356_v5 }
 0x294   :  { %v876_v10 = vpop.xlane.xlu1 %875 }
 0x295   :  { %2402 = vrsqrt.f32 %v1211_v15  ;;  %v3376_v26 = vmul.f32 0.0078125, %v876_v10  ;;  %v1088_v39 = vmul.f32 %v3374_v4, %v3374_v4 }
 0x296   :  { %v870_v6 = vpop.xlane.xlu0 %869 }
 0x297   :  { %v3378_v30 = vmul.f32 0.0078125, %v870_v6  ;;  %v1089_v34 = vmul.f32 %v3376_v26, %v3376_v26 }
 0x298   :  { %v872_v44 = vpop.xlane.xlu1 %871 }
 0x299   :  { %v2397_v60 = vpop.eup %2396  ;;  %v3382_v51 = vmul.f32 0.0078125, %v872_v44  ;;  %v1086_v63 = vmul.f32 %v3378_v30, %v3378_v30 }
 0x29a   :  { %v1003_v11 = vpop.xlane.xlu0 %1002 }
 0x29b   :  { %v1056_v59 = vmul.f32 0.0078125, %v1003_v11  ;;  %v2399_v40 = vpop.eup %2398  ;;  %v1087_v44 = vmul.f32 %v3382_v51, %v3382_v51 }
 0x29c   :  { %v1005_v62 = vpop.xlane.xlu1 %1004  ;;  %v1277_v6 = vmul.f32 %v2399_v40, %v1181_v31 }
 0x29d   :  { %v2401_v27 = vpop.eup %2400  ;;  %v1120_v50 = vsub.f32 %v1056_v59, %v1088_v39  ;;  %v1057_v32 = vmul.f32 0.0078125, %v1005_v62  ;;  %v1276_v39 = vmul.f32 %v2397_v60, %v1180_v13 }
 0x29e   :  { %v999_v42 = vpop.xlane.xlu0 %998  ;;  %v1274_v38 = vmul.f32 %v2401_v27, %v1178_v22 }
 0x29f   :  { %v2403_v15 = vpop.eup %2402  ;;  %v1152_v25 = vmax.f32 %v1120_v50, 0.0  ;;  %v1121_v21 = vsub.f32 %v1057_v32, %v1089_v34  ;;  %v1054_v10 = vmul.f32 0.0078125, %v999_v42  ;;  %v1305_v50 = vpack.c.bf16 %v1277_v6, %v1276_v39 }
 0x2a0   :  { %v1001_v11 = vpop.xlane.xlu1 %1000  ;;  %v1275_v56 = vmul.f32 %v2403_v15, %v1179_v53  ;;  %v3403_v53 = vmul.f32 0.0078125, %v3312_v17 }
 0x2a1   :  { %v1216_v14 = vadd.f32 1e-05, %v1152_v25  ;;  %v1153_v61 = vmax.f32 %v1121_v21, 0.0  ;;  %v1118_v59 = vsub.f32 %v1054_v10, %v1086_v63  ;;  %v1055_v37 = vmul.f32 0.0078125, %v1001_v11 }
 0x2a2   :  { %v882_v5 = vpop.xlane.xlu0 %881  ;;  %v1304_v62 = vpack.c.bf16 %v1275_v56, %v1274_v38  ;;  %v3406_v63 = vmul.f32 0.0078125, %v3319_v58  ;;  %v3416_v25 = vmul.f32 0.0078125, %v3344_v57  ;;  %v1066_v21 = vmul.f32 0.0078125, %v3370_v45 }
 0x2a3   :  { %v1217_v55 = vadd.f32 1e-05, %v1153_v61  ;;  %v1150_v12 = vmax.f32 %v1118_v59, 0.0  ;;  %v1119_v46 = vsub.f32 %v1055_v37, %v1087_v44  ;;  %2404 = vrsqrt.f32 %v1216_v14 }
 0x2a4   :  { %v884_v34 = vpop.xlane.xlu1 %883  ;;  %2218 = vmatprep.mubr.bf16.mxu1 %v1304_v62  ;;  %v3398_v32 = vmul.f32 0.0078125, %v882_v5  ;;  %v1100_v44 = vmul.f32 %v3403_v53, %v3403_v53  ;;  %v1101_v11 = vmul.f32 %v3406_v63, %v3406_v63  ;;  %v1067_v38 = vmul.f32 0.0078125, %v3372_v54 }
 0x2a5   :  { %v1214_v40 = vadd.f32 1e-05, %v1150_v12  ;;  %v1151_v31 = vmax.f32 %v1119_v46, 0.0  ;;  %2219 = vmatmul.mubr.bf16.gmra.mrb[20].mxu1 %v1305_v50  ;;  %2406 = vrsqrt.f32 %v1217_v55  ;;  %v3400_v22 = vmul.f32 0.0078125, %v884_v34 }
 0x2a6   :  { %v878_v27 = vpop.xlane.xlu0 %877  ;;  %v3409_v12 = vmul.f32 0.0078125, %v3336_v29  ;;  %v1092_v55 = vmul.f32 %v3398_v32, %v3398_v32  ;;  %v1099_v5 = vmul.f32 %v3416_v25, %v3416_v25  ;;  %v1185_v50 = vsub.f32 %v3160_v1, %v3376_v26 }
 0x2a7   :  { %2408 = vrsqrt.f32 %v1214_v40  ;;  %v1215_v60 = vadd.f32 1e-05, %v1151_v31  ;;  %v3413_v42 = vmul.f32 0.0078125, %v878_v27  ;;  %v1093_v58 = vmul.f32 %v3400_v22, %v3400_v22 }
 0x2a8   :  { %v880_v13 = vpop.xlane.xlu1 %879  ;;  %v1098_v57 = vmul.f32 %v3409_v12, %v3409_v12 }
 0x2a9   :  { %2410 = vrsqrt.f32 %v1215_v60  ;;  %v3419_v17 = vmul.f32 0.0078125, %v880_v13  ;;  %v1090_v39 = vmul.f32 %v3413_v42, %v3413_v42 }
 0x2aa   :  { %v1011_v46 = vpop.xlane.xlu0 %1010  ;;  %v1130_v62 = vsub.f32 %v1066_v21, %v1098_v57  ;;  %v1183_v21 = vsub.f32 %v3168_v23, %v3382_v51 }
 0x2ab   :  { %v1060_v15 = vmul.f32 0.0078125, %v1011_v46  ;;  %v1091_v34 = vmul.f32 %v3419_v17, %v3419_v17  ;;  %v1131_v46 = vsub.f32 %v1067_v38, %v1099_v5 }
 0x2ac   :  { %v1013_v10 = vpop.xlane.xlu1 %1012 }
 0x2ad   :  { %v1124_v29 = vsub.f32 %v1060_v15, %v1092_v55  ;;  %v1061_v6 = vmul.f32 0.0078125, %v1013_v10  ;;  %v2405_v56 = vpop.eup %2404  ;;  %v1184_v55 = vsub.f32 %v3153_v33, %v3374_v4  ;;  %v1182_v15 = vsub.f32 %v3165_v52, %v3378_v30 }
 0x2ae   :  { %v1007_v45 = vpop.xlane.xlu0 %1006 }
 0x2af   :  { %v1156_v14 = vmax.f32 %v1124_v29, 0.0  ;;  %v1125_v61 = vsub.f32 %v1061_v6, %v1093_v58  ;;  %v1058_v59 = vmul.f32 0.0078125, %v1007_v45  ;;  %v2407_v37 = vpop.eup %2406  ;;  %v1280_v38 = vmul.f32 %v2405_v56, %v1184_v55 }
 0x2b0   :  { %v1009_v54 = vpop.xlane.xlu1 %1008  ;;  %v1281_v6 = vmul.f32 %v2407_v37, %v1185_v50 }
 0x2b1   :  { %v2409_v40 = vpop.eup %2408  ;;  %v1220_v31 = vadd.f32 1e-05, %v1156_v14  ;;  %v1157_v27 = vmax.f32 %v1125_v61, 0.0  ;;  %v1122_v60 = vsub.f32 %v1058_v59, %v1090_v39  ;;  %v1059_v13 = vmul.f32 0.0078125, %v1009_v54 }
 0x2b2   :  { %v1027_v1 = vpop.xlane.xlu0 %1026  ;;  %v1278_v39 = vmul.f32 %v2409_v40, %v1182_v15  ;;  %v1163_v59 = vmax.f32 %v1131_v46, 0.0  ;;  %v1307_v54 = vpack.c.bf16 %v1281_v6, %v1280_v38  ;;  %v1189_v6 = vsub.f32 %v3188_v0, %v3400_v22 }
 0x2b3   :  { %v2411_v26 = vpop.eup %2410  ;;  %v1221_v10 = vadd.f32 1e-05, %v1157_v27  ;;  %v1154_v58 = vmax.f32 %v1122_v60, 0.0  ;;  %v1123_v29 = vsub.f32 %v1059_v13, %v1091_v34  ;;  %v1068_v57 = vmul.f32 0.0078125, %v1027_v1 }
 0x2b4   :  { %v1029_v45 = vpop.xlane.xlu1 %1028  ;;  %v1279_v14 = vmul.f32 %v2411_v26, %v1183_v21  ;;  %2412 = vrsqrt.f32 %v1220_v31  ;;  %v1162_v34 = vmax.f32 %v1130_v62, 0.0  ;;  %v1227_v27 = vadd.f32 1e-05, %v1163_v59 }
 0x2b5   :  { %v1218_v61 = vadd.f32 1e-05, %v1154_v58  ;;  %v1155_v33 = vmax.f32 %v1123_v29, 0.0  ;;  %v1069_v4 = vmul.f32 0.0078125, %v1029_v45  ;;  %2414 = vrsqrt.f32 %v1221_v10 }
 0x2b6   :  { %v1132_v52 = vsub.f32 %v1068_v57, %v1100_v44  ;;  %v902_v30 = vpop.xlane.xlu0 %901  ;;  %v1306_v23 = vpack.c.bf16 %v1279_v14, %v1278_v39  ;;  %v1226_v44 = vadd.f32 1e-05, %v1162_v34  ;;  %v1188_v14 = vsub.f32 %v3184_v49, %v3398_v32 }
 0x2b7   :  { %2416 = vrsqrt.f32 %v1218_v61  ;;  %v1219_v51 = vadd.f32 1e-05, %v1155_v33  ;;  %v1133_v5 = vsub.f32 %v1069_v4, %v1101_v11  ;;  %v3444_v13 = vmul.f32 0.0078125, %v902_v30 }
 0x2b8   :  { %v1164_v37 = vmax.f32 %v1132_v52, 0.0  ;;  %v904_v50 = vpop.xlane.xlu1 %903  ;;  %2222 = vmatprep.mubr.bf16.mxu1 %v1306_v23  ;;  %v1186_v38 = vsub.f32 %v3193_v28, %v3413_v42  ;;  %v1187_v61 = vsub.f32 %v3196_v41, %v3419_v17  ;;  %v1196_v34 = vsub.f32 %v3086_v20, %v3403_v53 }
 0x2b9   :  { %2418 = vrsqrt.f32 %v1219_v51  ;;  %v1165_v40 = vmax.f32 %v1133_v5, 0.0  ;;  %2223 = vmatmul.mubr.bf16.gmra.mrb[24].mxu1 %v1307_v54  ;;  %v3446_v55 = vmul.f32 0.0078125, %v904_v50  ;;  %v1102_v21 = vmul.f32 %v3444_v13, %v3444_v13 }
 0x2ba   :  { %v1228_v56 = vadd.f32 1e-05, %v1164_v37  ;;  %v906_v31 = vpop.xlane.xlu0 %905  ;;  %v1197_v37 = vsub.f32 %v3096_v9, %v3406_v63  ;;  %v1195_v9 = vsub.f32 %v3116_v43, %v3416_v25  ;;  %v3732_v53 = vpack.c.bf16 %v3360_v47, %v3358_v8 }
 0x2bb   :  { %v1229_v60 = vadd.f32 1e-05, %v1165_v40  ;;  %v3448_v11 = vmul.f32 0.0078125, %v906_v31  ;;  %v1103_v57 = vmul.f32 %v3446_v55, %v3446_v55 }
 0x2bc   :  { %2420 = vrsqrt.f32 %v1228_v56  ;;  %v908_v46 = vpop.xlane.xlu1 %907 }
 0x2bd   :  { %2422 = vrsqrt.f32 %v1229_v60  ;;  %v3452_v10 = vmul.f32 0.0078125, %v908_v46  ;;  %v1104_v33 = vmul.f32 %v3448_v11, %v3448_v11 }
 0x2be   :  { %v1031_v62 = vpop.xlane.xlu0 %1030  ;;  %v2413_v15 = vpop.eup %2412  ;;  %2424 = vrsqrt.f32 %v1227_v27 }
 0x2bf   :  { %v1070_v1 = vmul.f32 0.0078125, %v1031_v62  ;;  %v2415_v26 = vpop.eup %2414  ;;  %2426 = vrsqrt.f32 %v1226_v44  ;;  %v1105_v23 = vmul.f32 %v3452_v10, %v3452_v10  ;;  %v1284_v5 = vmul.f32 %v2413_v15, %v1188_v14 }
 0x2c0   :  { %v1033_v58 = vpop.xlane.xlu1 %1032  ;;  %v1285_v30 = vmul.f32 %v2415_v26, %v1189_v6  ;;  %v1194_v6 = vsub.f32 %v3110_v35, %v3409_v12 }
 0x2c1   :  { %v2417_v29 = vpop.eup %2416  ;;  %v1134_v45 = vsub.f32 %v1070_v1, %v1102_v21  ;;  %v1071_v39 = vmul.f32 0.0078125, %v1033_v58 }
 0x2c2   :  { %v1035_v4 = vpop.xlane.xlu0 %1034  ;;  %v1282_v49 = vmul.f32 %v2417_v29, %v1186_v38  ;;  %v1309_v60 = vpack.c.bf16 %v1285_v30, %v1284_v5 }
 0x2c3   :  { %v2419_v59 = vpop.eup %2418  ;;  %v1166_v0 = vmax.f32 %v1134_v45, 0.0  ;;  %v1135_v22 = vsub.f32 %v1071_v39, %v1103_v57  ;;  %v1072_v52 = vmul.f32 0.0078125, %v1035_v4 }
 0x2c4   :  { %v1037_v51 = vpop.xlane.xlu1 %1036  ;;  %v1283_v32 = vmul.f32 %v2419_v59, %v1187_v61 }
 0x2c5   :  { %v1230_v28 = vadd.f32 1e-05, %v1166_v0  ;;  %v1167_v42 = vmax.f32 %v1135_v22, 0.0  ;;  %v1136_v54 = vsub.f32 %v1072_v52, %v1104_v33  ;;  %v1073_v41 = vmul.f32 0.0078125, %v1037_v51 }
 0x2c6   :  { %v2421_v17 = vpop.eup %2420  ;;  %v910_v50 = vpop.xlane.xlu0 %909  ;;  %v1308_v40 = vpack.c.bf16 %v1283_v32, %v1282_v49  ;;  %v3733_v0 = vpack.c.bf16 %v3328_v2, %v3323_v3  ;;  %v1199_v52 = vsub.f32 %v3222_v16, %v3446_v55 }
 0x2c7   :  { %v2423_v56 = vpop.eup %2422  ;;  %v1231_v31 = vadd.f32 1e-05, %v1167_v42  ;;  %v1137_v27 = vsub.f32 %v1073_v41, %v1105_v23  ;;  %2428 = vrsqrt.f32 %v1230_v28  ;;  %v1168_v44 = vmax.f32 %v1136_v54, 0.0 }
 0x2c8   :  { %v912_v46 = vpop.xlane.xlu1 %911  ;;  %2226 = vmatprep.mubr.bf16.mxu1 %v1308_v40  ;;  %v1292_v62 = vmul.f32 %v2421_v17, %v1196_v34  ;;  %v1293_v15 = vmul.f32 %v2423_v56, %v1197_v37  ;;  %v2425_v21 = vpop.eup %2424  ;;  %v3477_v29 = vmul.f32 0.0078125, %v910_v50  ;;  %v1198_v28 = vsub.f32 %v3218_v36, %v3444_v13 }
 0x2c9   :  { %2430 = vrsqrt.f32 %v1231_v31  ;;  %v1169_v1 = vmax.f32 %v1137_v27, 0.0  ;;  %2227 = vmatmul.mubr.bf16.gmra.mrb[28].mxu1 %v1309_v60  ;;  %v2427_v20 = vpop.eup %2426  ;;  %v1232_v57 = vadd.f32 1e-05, %v1168_v44  ;;  %v1291_v39 = vmul.f32 %v2425_v21, %v1195_v9  ;;  %v2314_v21 = vld [vmem:[%s3726_s5 + $0x30] sm:$0xff]  }
 0x2ca   :  { %2230 = vmatprep.mubr.bf16.mxu1 %v3732_v53  ;;  %v914_v63 = vpop.xlane.xlu0 %913  ;;  %v1313_v26 = vpack.c.bf16 %v1293_v15, %v1292_v62  ;;  %v3481_v14 = vmul.f32 0.0078125, %v912_v46  ;;  %v1290_v43 = vmul.f32 %v2427_v20, %v1194_v6  ;;  %v1106_v8 = vmul.f32 %v3477_v29, %v3477_v29  ;;  %2258 = vmatprep.subr.bf16.mxu0 %v2314_v21 }
 0x2cb   :  { %v1233_v58 = vadd.f32 1e-05, %v1169_v1  ;;  %v3485_v47 = vmul.f32 0.0078125, %v914_v63  ;;  %v1201_v31 = vsub.f32 %v3228_v7, %v3452_v10  ;;  %v1200_v60 = vsub.f32 %v3225_v48, %v3448_v11  ;;  %2259 = vmatpush3.bf16.msra.mxu0 %v2314_v21  ;;  %v2315_v11 = vld [vmem:[%s3726_s5 + $0x38] sm:$0xff]  }
 0x2cc   :  { %v916_v45 = vpop.xlane.xlu1 %915  ;;  %v1312_v4 = vpack.c.bf16 %v1291_v39, %v1290_v43  ;;  %v1107_v35 = vmul.f32 %v3481_v14, %v3481_v14  ;;  %v1202_v10 = vsub.f32 %v3246_v18, %v3477_v29  ;;  %v1203_v1 = vsub.f32 %v3250_v19, %v3481_v14  ;;  %2260 = vmatprep.subr.bf16.mxu0 %v2315_v11 }
 0x2cd   :  { %2432 = vrsqrt.f32 %v1233_v58  ;;  %v3487_v61 = vmul.f32 0.0078125, %v916_v45  ;;  %v1108_v51 = vmul.f32 %v3485_v47, %v3485_v47  ;;  %v1204_v63 = vsub.f32 %v3253_v24, %v3485_v47  ;;  %v3523_v45 = vld [vmem:[%s3727_s4] ss:$0 sm:$0xff] }
 0x2ce   :  { %v1039_v38 = vpop.xlane.xlu0 %1038  ;;  %2434 = vrsqrt.f32 %v1232_v57 }
 0x2cf   :  { %v1074_v25 = vmul.f32 0.0078125, %v1039_v38  ;;  %v1109_v3 = vmul.f32 %v3487_v61, %v3487_v61  ;;  %2261 = vmatpush3.bf16.msra.mxu0 %v2315_v11 }
 0x2d0   :  { %v1041_v33 = vpop.xlane.xlu1 %1040 }
 0x2d1   :  { %v1138_v12 = vsub.f32 %v1074_v25, %v1106_v8  ;;  %v1075_v59 = vmul.f32 0.0078125, %v1041_v33  ;;  %2231 = vmatmul.mubr.bf16.gmra.mrb[32].mxu1 %v3733_v0  ;;  %v2429_v22 = vpop.eup %2428 }
 0x2d2   :  { %2234 = vmatprep.mubr.bf16.mxu1 %v1312_v4  ;;  %v1043_v30 = vpop.xlane.xlu0 %1042  ;;  %v1294_v17 = vmul.f32 %v2429_v22, %v1198_v28 }
 0x2d3   :  { %v2431_v23 = vpop.eup %2430  ;;  %v1170_v49 = vmax.f32 %v1138_v12, 0.0  ;;  %v1139_v32 = vsub.f32 %v1075_v59, %v1107_v35  ;;  %v1076_v5 = vmul.f32 0.0078125, %v1043_v30 }
 0x2d4   :  { %v1045_v2 = vpop.xlane.xlu1 %1044  ;;  %v1295_v42 = vmul.f32 %v2431_v23, %v1199_v52 }
 0x2d5   :  { %v1234_v54 = vadd.f32 1e-05, %v1170_v49  ;;  %v1171_v41 = vmax.f32 %v1139_v32, 0.0  ;;  %v1140_v16 = vsub.f32 %v1076_v5, %v1108_v51  ;;  %v1077_v55 = vmul.f32 0.0078125, %v1045_v2 }
 0x2d6   :  { %v1314_v56 = vpack.c.bf16 %v1295_v42, %v1294_v17 }
 0x2d7   :  { %2436 = vrsqrt.f32 %v1234_v54  ;;  %v1235_v34 = vadd.f32 1e-05, %v1171_v41  ;;  %v1172_v37 = vmax.f32 %v1140_v16, 0.0  ;;  %v1141_v50 = vsub.f32 %v1077_v55, %v1109_v3  ;;  %v2433_v40 = vpop.eup %2432 }
 0x2d8   :  { %v2435_v27 = vpop.eup %2434  ;;  %v1297_v46 = vmul.f32 %v2433_v40, %v1201_v31 }
 0x2d9   :  { %2438 = vrsqrt.f32 %v1235_v34  ;;  %v1236_v36 = vadd.f32 1e-05, %v1172_v37  ;;  %v1173_v13 = vmax.f32 %v1141_v50, 0.0  ;;  %2235 = vmatmul.mubr.bf16.gmra.mrb[36].mxu1 %v1313_v26  ;;  %v1296_v62 = vmul.f32 %v2435_v27, %v1200_v60  ;;  %v3734_v26 = vld [vmem:[#allocation2_spill] sm:$0xff] }
 0x2da   :  { %2238 = vmatprep.mubr.bf16.mxu1 %v1314_v56  ;;  %v1205_v58 = vsub.f32 %v3734_v26, %v3487_v61 }
 0x2db   :  { %2440 = vrsqrt.f32 %v1236_v36  ;;  %v1237_v44 = vadd.f32 1e-05, %v1173_v13  ;;  %v1315_v15 = vpack.c.bf16 %v1297_v46, %v1296_v62 }
 0x2dd   :  { %2442 = vrsqrt.f32 %v1237_v44 }
 0x2e1   :  { %v2437_v7 = vpop.eup %2436  ;;  %2239 = vmatmul.mubr.bf16.gmra.mrb[40].mxu1 %v1315_v15 }
 0x2e2   :  { %v1298_v20 = vmul.f32 %v2437_v7, %v1202_v10 }
 0x2e3   :  { %v2439_v48 = vpop.eup %2438 }
 0x2e4   :  { %v1299_v9 = vmul.f32 %v2439_v48, %v1203_v1 }
 0x2e5   :  { %v2441_v53 = vpop.eup %2440 }
 0x2e6   :  { %v1316_v18 = vpack.c.bf16 %v1299_v9, %v1298_v20  ;;  %v1300_v19 = vmul.f32 %v2441_v53, %v1204_v63 }
 0x2e7   :  { %v2443_v29 = vpop.eup %2442 }
 0x2e8   :  { %2242 = vmatprep.mubr.bf16.mxu1 %v1316_v18  ;;  %v1301_v6 = vmul.f32 %v2443_v29, %v1205_v58 }
 0x2ea   :  { %v1317_v57 = vpack.c.bf16 %v1301_v6, %v1300_v19 }
 0x2ec   :  { %2243 = vmatmul.mubr.bf16.gmra.mrb[44].mxu1 %v1317_v57 }
 0x35c   :  { %v2216_v39 = vpop.f32.mrb[16].mxu1 }
 0x35d   :  { %v1432_v14 = vadd.f32 %v2216_v39, %v3523_v45  ;;  %v1423_v24 = vpop.f32.mrb[17].mxu1 }
 0x35e   :  { %v1424_v38 = vadd.f32 %v3523_v45, %v1423_v24  ;;  %v2217_v43 = vpop.f32.mrb[18].mxu1 }
 0x35f   :  { %v1435_v8 = vadd.f32 %v2217_v43, %v3523_v45  ;;  %v1426_v47 = vpop.f32.mrb[19].mxu1  ;;  %v1552_v61 = vmax.f32 %v1432_v14, 0.0 }
 0x360   :  { %v1427_v25 = vadd.f32 %v3523_v45, %v1426_v47  ;;  %v1550_v4 = vmax.f32 %v1424_v38, 0.0 }
 0x361   :  { %v1553_v33 = vmax.f32 %v1435_v8, 0.0 }
 0x362   :  { %v1551_v35 = vmax.f32 %v1427_v25, 0.0 }
 0x363   :  { %v1583_v12 = vpack.c.bf16 %v1553_v33, %v1552_v61 }
 0x364   :  { %v1582_v59 = vpack.c.bf16 %v1551_v35, %v1550_v4 }
 0x366   :  { %2262 = vmatprep.mubr.bf16.mxu0 %v1582_v59 }
 0x367   :  { %2263 = vmatmul.mubr.bf16.vlgmr.msra.gmra.mrb[16].mxu0 %v1583_v12 }
 0x378   :  { %v2220_v0 = vpop.f32.mrb[20].mxu1 }
 0x379   :  { %v1448_v22 = vadd.f32 %v2220_v0, %v3523_v45  ;;  %v1439_v52 = vpop.f32.mrb[21].mxu1 }
 0x37a   :  { %v1440_v30 = vadd.f32 %v3523_v45, %v1439_v52  ;;  %v2221_v23 = vpop.f32.mrb[22].mxu1 }
 0x37b   :  { %v1451_v51 = vadd.f32 %v2221_v23, %v3523_v45  ;;  %v1442_v49 = vpop.f32.mrb[23].mxu1  ;;  %v1556_v5 = vmax.f32 %v1448_v22, 0.0 }
 0x37c   :  { %v1443_v32 = vadd.f32 %v3523_v45, %v1442_v49  ;;  %v1554_v3 = vmax.f32 %v1440_v30, 0.0 }
 0x37d   :  { %v1557_v28 = vmax.f32 %v1451_v51, 0.0 }
 0x37e   :  { %v1555_v2 = vmax.f32 %v1443_v32, 0.0 }
 0x37f   :  { %v1585_v42 = vpack.c.bf16 %v1557_v28, %v1556_v5 }
 0x380   :  { %v1584_v54 = vpack.c.bf16 %v1555_v2, %v1554_v3 }
 0x382   :  { %2266 = vmatprep.mubr.bf16.mxu0 %v1584_v54 }
 0x383   :  { %2267 = vmatmul.mubr.bf16.gmra.mrb[20].mxu0 %v1585_v42 }
 0x38c   :  { %v2224_v41 = vpop.f32.mrb[24].mxu1 }
 0x38d   :  { %v1464_v16 = vadd.f32 %v2224_v41, %v3523_v45  ;;  %v1455_v55 = vpop.f32.mrb[25].mxu1 }
 0x38e   :  { %v1456_v17 = vadd.f32 %v3523_v45, %v1455_v55  ;;  %v2225_v34 = vpop.f32.mrb[26].mxu1 }
 0x38f   :  { %v1467_v37 = vadd.f32 %v2225_v34, %v3523_v45  ;;  %v1458_v50 = vpop.f32.mrb[27].mxu1  ;;  %v1560_v56 = vmax.f32 %v1464_v16, 0.0 }
 0x390   :  { %v1459_v40 = vadd.f32 %v3523_v45, %v1458_v50  ;;  %v1558_v36 = vmax.f32 %v1456_v17, 0.0 }
 0x391   :  { %v1561_v31 = vmax.f32 %v1467_v37, 0.0 }
 0x392   :  { %v1559_v13 = vmax.f32 %v1459_v40, 0.0 }
 0x393   :  { %v1587_v27 = vpack.c.bf16 %v1561_v31, %v1560_v56 }
 0x394   :  { %v1586_v60 = vpack.c.bf16 %v1559_v13, %v1558_v36 }
 0x396   :  { %2270 = vmatprep.mubr.bf16.mxu0 %v1586_v60 }
 0x397   :  { %2271 = vmatmul.mubr.bf16.gmra.mrb[24].mxu0 %v1587_v27 }
 0x39c   :  { %v2228_v44 = vpop.f32.mrb[28].mxu1 }
 0x39d   :  { %v1480_v46 = vadd.f32 %v2228_v44, %v3523_v45  ;;  %v1471_v62 = vpop.f32.mrb[29].mxu1 }
 0x39e   :  { %v1472_v15 = vadd.f32 %v3523_v45, %v1471_v62  ;;  %v2229_v21 = vpop.f32.mrb[30].mxu1 }
 0x39f   :  { %v1483_v7 = vadd.f32 %v2229_v21, %v3523_v45  ;;  %v1474_v10 = vpop.f32.mrb[31].mxu1  ;;  %v1564_v48 = vmax.f32 %v1480_v46, 0.0 }
 0x3a0   :  { %v1475_v1 = vadd.f32 %v3523_v45, %v1474_v10  ;;  %v1562_v20 = vmax.f32 %v1472_v15, 0.0 }
 0x3a1   :  { %v1565_v11 = vmax.f32 %v1483_v7, 0.0 }
 0x3a2   :  { %v1563_v9 = vmax.f32 %v1475_v1, 0.0  ;;  %v3560_v1 = vld [vmem:[%s3728_s6] ss:$0 sm:$0xff] }
 0x3a3   :  { %v1589_v53 = vpack.c.bf16 %v1565_v11, %v1564_v48 }
 0x3a4   :  { %v1588_v63 = vpack.c.bf16 %v1563_v9, %v1562_v20  ;;  %v2232_v26 = vpop.f32.mrb[32].mxu1 }
 0x3a5   :  { %v1496_v58 = vadd.f32 %v2232_v26, %v3523_v45  ;;  %v1487_v18 = vpop.f32.mrb[33].mxu1 }
 0x3a6   :  { %v1488_v29 = vadd.f32 %v3523_v45, %v1487_v18  ;;  %v2233_v19 = vpop.f32.mrb[34].mxu1  ;;  %2274 = vmatprep.mubr.bf16.mxu0 %v1588_v63 }
 0x3a7   :  { %v1499_v6 = vadd.f32 %v2233_v19, %v3523_v45  ;;  %v1490_v57 = vpop.f32.mrb[35].mxu1  ;;  %2275 = vmatmul.mubr.bf16.gmra.mrb[28].mxu0 %v1589_v53  ;;  %v1568_v14 = vmax.f32 %v1496_v58, 0.0 }
 0x3a8   :  { %v1491_v39 = vadd.f32 %v3523_v45, %v1490_v57  ;;  %v1566_v38 = vmax.f32 %v1488_v29, 0.0 }
 0x3a9   :  { %v1569_v24 = vmax.f32 %v1499_v6, 0.0 }
 0x3aa   :  { %v1567_v43 = vmax.f32 %v1491_v39, 0.0 }
 0x3ab   :  { %v1591_v8 = vpack.c.bf16 %v1569_v24, %v1568_v14 }
 0x3ac   :  { %v1590_v47 = vpack.c.bf16 %v1567_v43, %v1566_v38  ;;  %v2236_v25 = vpop.f32.mrb[36].mxu1 }
 0x3ad   :  { %v1512_v61 = vadd.f32 %v2236_v25, %v3523_v45  ;;  %v1503_v33 = vpop.f32.mrb[37].mxu1 }
 0x3ae   :  { %v1504_v4 = vadd.f32 %v3523_v45, %v1503_v33  ;;  %v2237_v35 = vpop.f32.mrb[38].mxu1  ;;  %2278 = vmatprep.mubr.bf16.mxu0 %v1590_v47 }
 0x3af   :  { %v1515_v12 = vadd.f32 %v2237_v35, %v3523_v45  ;;  %v1506_v59 = vpop.f32.mrb[39].mxu1  ;;  %2279 = vmatmul.mubr.bf16.gmra.mrb[32].mxu0 %v1591_v8  ;;  %v1572_v22 = vmax.f32 %v1512_v61, 0.0 }
 0x3b0   :  { %v1507_v0 = vadd.f32 %v3523_v45, %v1506_v59  ;;  %v1570_v30 = vmax.f32 %v1504_v4, 0.0 }
 0x3b1   :  { %v1573_v52 = vmax.f32 %v1515_v12, 0.0 }
 0x3b2   :  { %v1571_v23 = vmax.f32 %v1507_v0, 0.0 }
 0x3b3   :  { %v1593_v51 = vpack.c.bf16 %v1573_v52, %v1572_v22 }
 0x3b4   :  { %v1592_v49 = vpack.c.bf16 %v1571_v23, %v1570_v30  ;;  %v2240_v32 = vpop.f32.mrb[40].mxu1 }
 0x3b5   :  { %v1528_v5 = vadd.f32 %v2240_v32, %v3523_v45  ;;  %v1519_v28 = vpop.f32.mrb[41].mxu1 }
 0x3b6   :  { %v1520_v3 = vadd.f32 %v3523_v45, %v1519_v28  ;;  %v2241_v2 = vpop.f32.mrb[42].mxu1  ;;  %2282 = vmatprep.mubr.bf16.mxu0 %v1592_v49 }
 0x3b7   :  { %v1531_v42 = vadd.f32 %v2241_v2, %v3523_v45  ;;  %v1522_v54 = vpop.f32.mrb[43].mxu1  ;;  %2283 = vmatmul.mubr.bf16.gmra.mrb[36].mxu0 %v1593_v51  ;;  %v1576_v16 = vmax.f32 %v1528_v5, 0.0 }
 0x3b8   :  { %v1523_v41 = vadd.f32 %v3523_v45, %v1522_v54  ;;  %v1574_v17 = vmax.f32 %v1520_v3, 0.0 }
 0x3b9   :  { %v1577_v55 = vmax.f32 %v1531_v42, 0.0 }
 0x3ba   :  { %v1575_v34 = vmax.f32 %v1523_v41, 0.0 }
 0x3bb   :  { %v1595_v37 = vpack.c.bf16 %v1577_v55, %v1576_v16 }
 0x3bc   :  { %v1594_v50 = vpack.c.bf16 %v1575_v34, %v1574_v17 }
 0x3be   :  { %2286 = vmatprep.mubr.bf16.mxu0 %v1594_v50 }
 0x3bf   :  { %v2244_v40 = vpop.f32.mrb[44].mxu1  ;;  %2287 = vmatmul.mubr.bf16.gmra.mrb[40].mxu0 %v1595_v37 }
 0x3c0   :  { %v1544_v56 = vadd.f32 %v2244_v40, %v3523_v45  ;;  %v1535_v31 = vpop.f32.mrb[45].mxu1 }
 0x3c1   :  { %v1536_v36 = vadd.f32 %v3523_v45, %v1535_v31  ;;  %v2245_v13 = vpop.f32.mrb[46].mxu1 }
 0x3c2   :  { %v1547_v27 = vadd.f32 %v2245_v13, %v3523_v45  ;;  %v1538_v60 = vpop.f32.mrb[47].mxu1  ;;  %v1580_v46 = vmax.f32 %v1544_v56, 0.0 }
 0x3c3   :  { %v1539_v44 = vadd.f32 %v3523_v45, %v1538_v60  ;;  %v1578_v15 = vmax.f32 %v1536_v36, 0.0 }
 0x3c4   :  { %v1581_v62 = vmax.f32 %v1547_v27, 0.0 }
 0x3c5   :  { %v1579_v21 = vmax.f32 %v1539_v44, 0.0 }
 0x3c6   :  { %v1597_v7 = vpack.c.bf16 %v1581_v62, %v1580_v46 }
 0x3c7   :  { %v1596_v10 = vpack.c.bf16 %v1579_v21, %v1578_v15 }
 0x3c9   :  { %2290 = vmatprep.mubr.bf16.mxu0 %v1596_v10 }
 0x3ca   :  { %2291 = vmatmul.mubr.bf16.gmra.mrb[44].mxu0 %v1597_v7 }
 0x43a   :  { %v2264_v48 = vpop.f32.mrb[16].mxu0 }
 0x43b   :  { %v1712_v11 = vadd.f32 %v2264_v48, %v3560_v1  ;;  %v1703_v20 = vpop.f32.mrb[17].mxu0 }
 0x43c   :  { %v1704_v45 = vadd.f32 %v3560_v1, %v1703_v20  ;;  %v2265_v9 = vpop.f32.mrb[18].mxu0 }
 0x43d   :  { %v2066_v53 = vpack.c.bf16 %v1712_v11, %v1712_v11  ;;  %v1715_v63 = vadd.f32 %v2265_v9, %v3560_v1  ;;  %v1706_v26 = vpop.f32.mrb[19].mxu0 }
 0x43e   :  { %v2064_v58 = vpack.c.bf16 %v1704_v45, %v1704_v45  ;;  %v1707_v18 = vadd.f32 %v3560_v1, %v1706_v26 }
 0x43f   :  { %1961 = vst.msk [vmem:[%s3729_s7 + $0x8] sm:$0xf] %vm1958_vm1, %v2066_v53  ;;  %v2067_v29 = vpack.c.bf16 %v1715_v63, %v1715_v63 }
 0x440   :  { %1959 = vst.msk [vmem:[%s3729_s7] sm:$0xf] %vm1958_vm1, %v2064_v58  ;;  %v2065_v19 = vpack.c.bf16 %v1707_v18, %v1707_v18 }
 0x441   :  { %1962 = vst.msk [vmem:[%s3729_s7 + $0xc] sm:$0xf] %vm1958_vm1, %v2067_v29 }
 0x442   :  { %1960 = vst.msk [vmem:[%s3729_s7 + $0x4] sm:$0xf] %vm1958_vm1, %v2065_v19 }
 0x456   :  { %v2268_v6 = vpop.f32.mrb[20].mxu0 }
 0x457   :  { %v1728_v57 = vadd.f32 %v2268_v6, %v3560_v1  ;;  %v1719_v39 = vpop.f32.mrb[21].mxu0 }
 0x458   :  { %v1720_v14 = vadd.f32 %v3560_v1, %v1719_v39  ;;  %v2269_v24 = vpop.f32.mrb[22].mxu0 }
 0x459   :  { %v2070_v38 = vpack.c.bf16 %v1728_v57, %v1728_v57  ;;  %v1731_v43 = vadd.f32 %v2269_v24, %v3560_v1  ;;  %v1722_v8 = vpop.f32.mrb[23].mxu0 }
 0x45a   :  { %v2068_v47 = vpack.c.bf16 %v1720_v14, %v1720_v14  ;;  %v1723_v25 = vadd.f32 %v3560_v1, %v1722_v8 }
 0x45b   :  { %1965 = vst.msk [vmem:[%s3729_s7 + $0x18] sm:$0xf] %vm1958_vm1, %v2070_v38  ;;  %v2071_v61 = vpack.c.bf16 %v1731_v43, %v1731_v43 }
 0x45c   :  { %1963 = vst.msk [vmem:[%s3729_s7 + $0x10] sm:$0xf] %vm1958_vm1, %v2068_v47  ;;  %v2069_v33 = vpack.c.bf16 %v1723_v25, %v1723_v25 }
 0x45d   :  { %1966 = vst.msk [vmem:[%s3729_s7 + $0x1c] sm:$0xf] %vm1958_vm1, %v2071_v61 }
 0x45e   :  { %1964 = vst.msk [vmem:[%s3729_s7 + $0x14] sm:$0xf] %vm1958_vm1, %v2069_v33 }
 0x46a   :  { %v2272_v4 = vpop.f32.mrb[24].mxu0 }
 0x46b   :  { %v1744_v35 = vadd.f32 %v2272_v4, %v3560_v1  ;;  %v1735_v12 = vpop.f32.mrb[25].mxu0 }
 0x46c   :  { %v1736_v59 = vadd.f32 %v3560_v1, %v1735_v12  ;;  %v2273_v0 = vpop.f32.mrb[26].mxu0 }
 0x46d   :  { %v2074_v22 = vpack.c.bf16 %v1744_v35, %v1744_v35  ;;  %v1747_v52 = vadd.f32 %v2273_v0, %v3560_v1  ;;  %v1738_v30 = vpop.f32.mrb[27].mxu0 }
 0x46e   :  { %v2072_v23 = vpack.c.bf16 %v1736_v59, %v1736_v59  ;;  %v1739_v51 = vadd.f32 %v3560_v1, %v1738_v30 }
 0x46f   :  { %1969 = vst.msk [vmem:[%s3729_s7 + $0x28] sm:$0xf] %vm1958_vm1, %v2074_v22  ;;  %v2075_v49 = vpack.c.bf16 %v1747_v52, %v1747_v52 }
 0x470   :  { %1967 = vst.msk [vmem:[%s3729_s7 + $0x20] sm:$0xf] %vm1958_vm1, %v2072_v23  ;;  %v2073_v32 = vpack.c.bf16 %v1739_v51, %v1739_v51 }
 0x471   :  { %1970 = vst.msk [vmem:[%s3729_s7 + $0x2c] sm:$0xf] %vm1958_vm1, %v2075_v49 }
 0x472   :  { %1968 = vst.msk [vmem:[%s3729_s7 + $0x24] sm:$0xf] %vm1958_vm1, %v2073_v32 }
 0x47a   :  { %v2276_v5 = vpop.f32.mrb[28].mxu0 }
 0x47b   :  { %v1760_v28 = vadd.f32 %v2276_v5, %v3560_v1  ;;  %v1751_v3 = vpop.f32.mrb[29].mxu0 }
 0x47c   :  { %v1752_v2 = vadd.f32 %v3560_v1, %v1751_v3  ;;  %v2277_v42 = vpop.f32.mrb[30].mxu0 }
 0x47d   :  { %v2078_v54 = vpack.c.bf16 %v1760_v28, %v1760_v28  ;;  %v1763_v41 = vadd.f32 %v2277_v42, %v3560_v1  ;;  %v1754_v16 = vpop.f32.mrb[31].mxu0 }
 0x47e   :  { %v2076_v55 = vpack.c.bf16 %v1752_v2, %v1752_v2  ;;  %v1755_v17 = vadd.f32 %v3560_v1, %v1754_v16 }
 0x47f   :  { %1973 = vst.msk [vmem:[%s3729_s7 + $0x38] sm:$0xf] %vm1958_vm1, %v2078_v54  ;;  %v2079_v34 = vpack.c.bf16 %v1763_v41, %v1763_v41 }
 0x480   :  { %1971 = vst.msk [vmem:[%s3729_s7 + $0x30] sm:$0xf] %vm1958_vm1, %v2076_v55  ;;  %v2077_v37 = vpack.c.bf16 %v1755_v17, %v1755_v17 }
 0x481   :  { %1974 = vst.msk [vmem:[%s3729_s7 + $0x3c] sm:$0xf] %vm1958_vm1, %v2079_v34 }
 0x482   :  { %1972 = vst.msk [vmem:[%s3729_s7 + $0x34] sm:$0xf] %vm1958_vm1, %v2077_v37  ;;  %v2280_v50 = vpop.f32.mrb[32].mxu0 }
 0x483   :  { %v1776_v40 = vadd.f32 %v2280_v50, %v3560_v1  ;;  %v1767_v56 = vpop.f32.mrb[33].mxu0 }
 0x484   :  { %v1768_v31 = vadd.f32 %v3560_v1, %v1767_v56  ;;  %v2281_v36 = vpop.f32.mrb[34].mxu0 }
 0x485   :  { %v2082_v13 = vpack.c.bf16 %v1776_v40, %v1776_v40  ;;  %v1779_v27 = vadd.f32 %v2281_v36, %v3560_v1  ;;  %v1770_v60 = vpop.f32.mrb[35].mxu0 }
 0x486   :  { %v2080_v44 = vpack.c.bf16 %v1768_v31, %v1768_v31  ;;  %v1771_v46 = vadd.f32 %v3560_v1, %v1770_v60 }
 0x487   :  { %1977 = vst.msk [vmem:[%s3729_s7 + $0x48] sm:$0xf] %vm1958_vm1, %v2082_v13  ;;  %v2083_v62 = vpack.c.bf16 %v1779_v27, %v1779_v27 }
 0x488   :  { %1975 = vst.msk [vmem:[%s3729_s7 + $0x40] sm:$0xf] %vm1958_vm1, %v2080_v44  ;;  %v2081_v15 = vpack.c.bf16 %v1771_v46, %v1771_v46 }
 0x489   :  { %1978 = vst.msk [vmem:[%s3729_s7 + $0x4c] sm:$0xf] %vm1958_vm1, %v2083_v62 }
 0x48a   :  { %1976 = vst.msk [vmem:[%s3729_s7 + $0x44] sm:$0xf] %vm1958_vm1, %v2081_v15  ;;  %v2284_v21 = vpop.f32.mrb[36].mxu0 }
 0x48b   :  { %v1792_v7 = vadd.f32 %v2284_v21, %v3560_v1  ;;  %v1783_v10 = vpop.f32.mrb[37].mxu0 }
 0x48c   :  { %v1784_v48 = vadd.f32 %v3560_v1, %v1783_v10  ;;  %v2285_v11 = vpop.f32.mrb[38].mxu0 }
 0x48d   :  { %v2086_v20 = vpack.c.bf16 %v1792_v7, %v1792_v7  ;;  %v1795_v45 = vadd.f32 %v2285_v11, %v3560_v1  ;;  %v1786_v9 = vpop.f32.mrb[39].mxu0 }
 0x48e   :  { %v2084_v53 = vpack.c.bf16 %v1784_v48, %v1784_v48  ;;  %v1787_v63 = vadd.f32 %v3560_v1, %v1786_v9 }
 0x48f   :  { %1981 = vst.msk [vmem:[%s3729_s7 + $0x58] sm:$0xf] %vm1958_vm1, %v2086_v20  ;;  %v2087_v26 = vpack.c.bf16 %v1795_v45, %v1795_v45 }
 0x490   :  { %1979 = vst.msk [vmem:[%s3729_s7 + $0x50] sm:$0xf] %vm1958_vm1, %v2084_v53  ;;  %v2085_v58 = vpack.c.bf16 %v1787_v63, %v1787_v63 }
 0x491   :  { %1982 = vst.msk [vmem:[%s3729_s7 + $0x5c] sm:$0xf] %vm1958_vm1, %v2087_v26 }
 0x492   :  { %1980 = vst.msk [vmem:[%s3729_s7 + $0x54] sm:$0xf] %vm1958_vm1, %v2085_v58  ;;  %v2288_v18 = vpop.f32.mrb[40].mxu0 }
 0x493   :  { %v1808_v29 = vadd.f32 %v2288_v18, %v3560_v1  ;;  %v1799_v19 = vpop.f32.mrb[41].mxu0 }
 0x494   :  { %v1800_v6 = vadd.f32 %v3560_v1, %v1799_v19  ;;  %v2289_v57 = vpop.f32.mrb[42].mxu0 }
 0x495   :  { %v2090_v39 = vpack.c.bf16 %v1808_v29, %v1808_v29  ;;  %v1811_v14 = vadd.f32 %v2289_v57, %v3560_v1  ;;  %v1802_v24 = vpop.f32.mrb[43].mxu0 }
 0x496   :  { %v2088_v38 = vpack.c.bf16 %v1800_v6, %v1800_v6  ;;  %v1803_v43 = vadd.f32 %v3560_v1, %v1802_v24 }
 0x497   :  { %1985 = vst.msk [vmem:[%s3729_s7 + $0x68] sm:$0xf] %vm1958_vm1, %v2090_v39  ;;  %v2091_v8 = vpack.c.bf16 %v1811_v14, %v1811_v14 }
 0x498   :  { %1983 = vst.msk [vmem:[%s3729_s7 + $0x60] sm:$0xf] %vm1958_vm1, %v2088_v38  ;;  %v2089_v47 = vpack.c.bf16 %v1803_v43, %v1803_v43 }
 0x499   :  { %1986 = vst.msk [vmem:[%s3729_s7 + $0x6c] sm:$0xf] %vm1958_vm1, %v2091_v8 }
 0x49a   :  { %1984 = vst.msk [vmem:[%s3729_s7 + $0x64] sm:$0xf] %vm1958_vm1, %v2089_v47 }
 0x49d   :  { %v2292_v25 = vpop.f32.mrb[44].mxu0 }
 0x49e   :  { %v1824_v61 = vadd.f32 %v2292_v25, %v3560_v1  ;;  %v1815_v33 = vpop.f32.mrb[45].mxu0 }
 0x49f   :  { %v1816_v4 = vadd.f32 %v3560_v1, %v1815_v33  ;;  %v2293_v35 = vpop.f32.mrb[46].mxu0 }
 0x4a0   :  { %v2094_v12 = vpack.c.bf16 %v1824_v61, %v1824_v61  ;;  %v1827_v59 = vadd.f32 %v2293_v35, %v3560_v1  ;;  %v1818_v0 = vpop.f32.mrb[47].mxu0 }
 0x4a1   :  { %v2092_v22 = vpack.c.bf16 %v1816_v4, %v1816_v4  ;;  %v1819_v52 = vadd.f32 %v3560_v1, %v1818_v0 }
 0x4a2   :  { %1989 = vst.msk [vmem:[%s3729_s7 + $0x78] sm:$0xf] %vm1958_vm1, %v2094_v12  ;;  %v2095_v30 = vpack.c.bf16 %v1827_v59, %v1827_v59 }
 0x4a3   :  { %1987 = vst.msk [vmem:[%s3729_s7 + $0x70] sm:$0xf] %vm1958_vm1, %v2092_v22  ;;  %v2093_v23 = vpack.c.bf16 %v1819_v52, %v1819_v52 }
 0x4a4   :  { %1990 = vst.msk [vmem:[%s3729_s7 + $0x7c] sm:$0xf] %vm1958_vm1, %v2095_v30 }
 0x4a5   :  { %1988 = vst.msk [vmem:[%s3729_s7 + $0x74] sm:$0xf] %vm1958_vm1, %v2093_v23 }

</bundles_post_ra>
